<compile_context>
chip_gen: v5e
topology: v5e:2x2
jax: 0.10.0
libtpu: 0.0.40
codegen_flags: <defaults>
</compile_context>

<pallas_src>
import functools

import jax
import jax.numpy as jnp
from jax.experimental import pallas as pl
from jax.experimental.pallas import tpu as pltpu

K_IN = 28 * 28      # 784 input features (nn.Flatten of 1x28x28)
K_PAD = 896         # 784 padded to 7*128 for lane-aligned K tiles
HID = 512
OUT = 10
OUT_PAD = 128       # 10 padded to one full lane width (unmasked stores)
TM_MAX = 512        # max batch-tile rows (review: amortize per-step overhead)


def mlp_kernel(x_ref, w1_ref, b1_ref, w2_ref, b2_ref, w3_ref, b3_ref, o_ref):
    # Layer 1: (TM,896)bf16 @ (896,512)bf16 -> f32 acc, + bias, ReLU
    h1 = jnp.dot(x_ref[...], w1_ref[...], preferred_element_type=jnp.float32)
    h1 = jnp.maximum(h1 + b1_ref[...], 0.0)
    # Dropout(0.25) in eval mode == identity.

    # Layer 2: (TM,512) @ (512,512) + bias -> ReLU
    h2 = jnp.dot(h1.astype(jnp.bfloat16), w2_ref[...],
                 preferred_element_type=jnp.float32)
    h2 = jnp.maximum(h2 + b2_ref[...], 0.0)
    # Dropout(0.25) in eval mode == identity.

    # Layer 3: (TM,512) @ (512,128) + bias -> ReLU (padded lanes are zero)
    h3 = jnp.dot(h2.astype(jnp.bfloat16), w3_ref[...],
                 preferred_element_type=jnp.float32)
    o_ref[...] = jnp.maximum(h3 + b3_ref[...], 0.0)


def _round_up(x, m):
    return ((x + m - 1) // m) * m


def _pick_tm(batch):
    """Adaptive batch tile: small batches -> tiny tile; large -> 512-row tiles
    with at least 2 grid steps so both v7x TensorCores are used."""
    if batch <= 256:
        return _round_up(batch, 16)            # bf16 sublane packing = 16 rows
    return max(128, min(TM_MAX, _round_up(pl.cdiv(batch, 2), 16)))


def prepare_params(params):
    """One-time weight prep (pad + bf16 cast), hoisted out of the forward."""
    w1, b1, w2, b2, w3, b3 = params
    w1p = jnp.pad(w1.astype(jnp.bfloat16), ((0, K_PAD - K_IN), (0, 0)))
    w2p = w2.astype(jnp.bfloat16)
    w3p = jnp.pad(w3.astype(jnp.bfloat16), ((0, 0), (0, OUT_PAD - OUT)))
    b1p = b1.astype(jnp.float32)
    b2p = b2.astype(jnp.float32)
    b3p = jnp.pad(b3.astype(jnp.float32), ((0, 0), (0, OUT_PAD - OUT)))
    return (w1p, b1p, w2p, b2p, w3p, b3p)


@jax.jit
def neural_network_forward(x_nchw, prepared_params):
    """x_nchw: (B, 1, 28, 28) float32. prepared_params from prepare_params().
    Returns (B, 10) float32."""
    B = x_nchw.shape[0]
    TM = _pick_tm(B)
    b_pad = pl.cdiv(B, TM) * TM
    n_tiles = b_pad // TM

    # nn.Flatten -> bf16 first, then pad (no full-size f32 temp in HBM).
    x_flat = x_nchw.reshape(B, -1).astype(jnp.bfloat16)
    x_p = jnp.pad(x_flat, ((0, b_pad - B), (0, K_PAD - K_IN)))

    w1p, b1, w2p, b2, w3p, b3p = prepared_params

    flops = 2 * b_pad * (K_PAD * HID + HID * HID + HID * OUT_PAD)
    bytes_accessed = (x_p.size * 2 + w1p.size * 2 + w2p.size * 2 + w3p.size * 2
                      + b1.size * 4 + b2.size * 4 + b3p.size * 4
                      + b_pad * OUT_PAD * 4)

    const2 = lambda i: (0, 0)
    out = pl.pallas_call(
        mlp_kernel,
        out_shape=jax.ShapeDtypeStruct((b_pad, OUT_PAD), jnp.float32),
        grid=(n_tiles,),
        in_specs=[
            pl.BlockSpec((TM, K_PAD), lambda i: (i, 0)),    # activation stream
            pl.BlockSpec((K_PAD, HID), const2),             # resident weights
            pl.BlockSpec((1, HID), const2),
            pl.BlockSpec((HID, HID), const2),
            pl.BlockSpec((1, HID), const2),
            pl.BlockSpec((HID, OUT_PAD), const2),
            pl.BlockSpec((1, OUT_PAD), const2),
        ],
        out_specs=pl.BlockSpec((TM, OUT_PAD), lambda i: (i, 0)),
        compiler_params=pltpu.CompilerParams(dimension_semantics=("parallel",)),
        cost_estimate=pl.CostEstimate(flops=flops, transcendentals=0,
                                      bytes_accessed=bytes_accessed),
    )(x_p, w1p, b1, w2p, b2, w3p, b3p)

    return out[:B, :OUT]


def init_params(key):
    """Deterministic parameter init (PyTorch nn.Linear-style uniform bounds)."""
    def linear(key, fan_in, fan_out):
        kw, kb = jax.random.split(key)
        bound = 1.0 / (fan_in ** 0.5)
        w = jax.random.uniform(kw, (fan_in, fan_out), jnp.float32, -bound, bound)
        b = jax.random.uniform(kb, (1, fan_out), jnp.float32, -bound, bound)
        return w, b

    k1, k2, k3 = jax.random.split(key, 3)
    w1, b1 = linear(k1, K_IN, HID)
    w2, b2 = linear(k2, HID, HID)
    w3, b3 = linear(k3, HID, OUT)
    return (w1, b1, w2, b2, w3, b3)


def reference_forward(x_nchw, params):
    """Pure-JAX reference, with matching bf16 rounding of matmul operands."""
    w1, b1, w2, b2, w3, b3 = params
    bf = lambda a: a.astype(jnp.bfloat16).astype(jnp.float32)
    x = bf(x_nchw.reshape(x_nchw.shape[0], -1))
    h1 = jnp.maximum(x @ bf(w1) + b1, 0.0)
    h2 = jnp.maximum(bf(h1) @ bf(w2) + b2, 0.0)
    return jnp.maximum(bf(h2) @ bf(w3) + b3, 0.0)


if __name__ == "__main__":
    key = jax.random.PRNGKey(0)
    kx, kp = jax.random.split(key)

    B = 8
    x = jax.random.normal(kx, (B, 1, 28, 28), dtype=jnp.float32)
    params = init_params(kp)
    prepared = prepare_params(params)          # one-time weight prep (hoisted)

    out = neural_network_forward(x, prepared)
    out = jax.block_until_ready(out)

    ref = reference_forward(x, params)
    assert out.shape == (B, 10), out.shape
    assert jnp.allclose(out, ref, atol=1e-2, rtol=1e-2), "mismatch vs reference"

    print("KERNEL_OK")
</pallas_src>

<mosaic_0001>
module attributes {stable_mosaic.version = 11 : i64} {
  func.func @mlp_kernel(%arg0: i32, %arg1: memref<16x896xbf16, #tpu.memory_space<vmem>>, %arg2: memref<896x512xbf16, #tpu.memory_space<vmem>>, %arg3: memref<1x512xf32, #tpu.memory_space<vmem>>, %arg4: memref<512x512xbf16, #tpu.memory_space<vmem>>, %arg5: memref<1x512xf32, #tpu.memory_space<vmem>>, %arg6: memref<512x128xbf16, #tpu.memory_space<vmem>>, %arg7: memref<1x128xf32, #tpu.memory_space<vmem>>, %arg8: memref<16x128xf32, #tpu.memory_space<vmem>>) attributes {dimension_semantics = [#tpu.dimension_semantics<parallel>], iteration_bounds = array<i64: 1>, scalar_prefetch = 0 : i64, scratch_operands = 0 : i64, tpu.core_type = #tpu.core_type<tc>, window_params = [{transform_indices = @transform_0, window_bounds = array<i64: 16, 896>}, {pipeline_mode = #tpu.pipeline_mode<synchronous>, transform_indices = @transform_1, window_bounds = array<i64: 896, 512>}, {pipeline_mode = #tpu.pipeline_mode<synchronous>, transform_indices = @transform_2, window_bounds = array<i64: 1, 512>}, {pipeline_mode = #tpu.pipeline_mode<synchronous>, transform_indices = @transform_3, window_bounds = array<i64: 512, 512>}, {pipeline_mode = #tpu.pipeline_mode<synchronous>, transform_indices = @transform_4, window_bounds = array<i64: 1, 512>}, {pipeline_mode = #tpu.pipeline_mode<synchronous>, transform_indices = @transform_5, window_bounds = array<i64: 512, 128>}, {pipeline_mode = #tpu.pipeline_mode<synchronous>, transform_indices = @transform_6, window_bounds = array<i64: 1, 128>}, {transform_indices = @transform_7, window_bounds = array<i64: 16, 128>}]} {
    %c0 = arith.constant 0 : index
    %c0_0 = arith.constant 0 : index
    %0 = vector.load %arg1[%c0, %c0_0] : memref<16x896xbf16, #tpu.memory_space<vmem>>, vector<16x896xbf16>
    %c0_1 = arith.constant 0 : index
    %c0_2 = arith.constant 0 : index
    %1 = vector.load %arg2[%c0_1, %c0_2] : memref<896x512xbf16, #tpu.memory_space<vmem>>, vector<896x512xbf16>
    %cst = arith.constant dense<0.000000e+00> : vector<16x512xf32>
    %2 = tpu.matmul %0, %1, %cst {dimension_numbers = #tpu.dot_dimension_numbers<[1], [0], [0], [1], [0, 0, 1, 1], [], []>} : vector<16x896xbf16>, vector<896x512xbf16>, vector<16x512xf32> -> vector<16x512xf32>
    %c0_3 = arith.constant 0 : index
    %c0_4 = arith.constant 0 : index
    %3 = vector.load %arg3[%c0_3, %c0_4] : memref<1x512xf32, #tpu.memory_space<vmem>>, vector<1x512xf32>
    %4 = vector.broadcast %3 : vector<1x512xf32> to vector<16x512xf32>
    %5 = arith.addf %2, %4 : vector<16x512xf32>
    %cst_5 = arith.constant 0.000000e+00 : f32
    %6 = vector.broadcast %cst_5 : f32 to vector<16x512xf32>
    %7 = arith.maximumf %5, %6 : vector<16x512xf32>
    %8 = arith.truncf %7 : vector<16x512xf32> to vector<16x512xbf16>
    %c0_6 = arith.constant 0 : index
    %c0_7 = arith.constant 0 : index
    %9 = vector.load %arg4[%c0_6, %c0_7] : memref<512x512xbf16, #tpu.memory_space<vmem>>, vector<512x512xbf16>
    %cst_8 = arith.constant dense<0.000000e+00> : vector<16x512xf32>
    %10 = tpu.matmul %8, %9, %cst_8 {dimension_numbers = #tpu.dot_dimension_numbers<[1], [0], [0], [1], [0, 0, 1, 1], [], []>} : vector<16x512xbf16>, vector<512x512xbf16>, vector<16x512xf32> -> vector<16x512xf32>
    %c0_9 = arith.constant 0 : index
    %c0_10 = arith.constant 0 : index
    %11 = vector.load %arg5[%c0_9, %c0_10] : memref<1x512xf32, #tpu.memory_space<vmem>>, vector<1x512xf32>
    %12 = vector.broadcast %11 : vector<1x512xf32> to vector<16x512xf32>
    %13 = arith.addf %10, %12 : vector<16x512xf32>
    %cst_11 = arith.constant 0.000000e+00 : f32
    %14 = vector.broadcast %cst_11 : f32 to vector<16x512xf32>
    %15 = arith.maximumf %13, %14 : vector<16x512xf32>
    %16 = arith.truncf %15 : vector<16x512xf32> to vector<16x512xbf16>
    %c0_12 = arith.constant 0 : index
    %c0_13 = arith.constant 0 : index
    %17 = vector.load %arg6[%c0_12, %c0_13] : memref<512x128xbf16, #tpu.memory_space<vmem>>, vector<512x128xbf16>
    %cst_14 = arith.constant dense<0.000000e+00> : vector<16x128xf32>
    %18 = tpu.matmul %16, %17, %cst_14 {dimension_numbers = #tpu.dot_dimension_numbers<[1], [0], [0], [1], [0, 0, 1, 1], [], []>} : vector<16x512xbf16>, vector<512x128xbf16>, vector<16x128xf32> -> vector<16x128xf32>
    %c0_15 = arith.constant 0 : index
    %c0_16 = arith.constant 0 : index
    %19 = vector.load %arg7[%c0_15, %c0_16] : memref<1x128xf32, #tpu.memory_space<vmem>>, vector<1x128xf32>
    %20 = vector.broadcast %19 : vector<1x128xf32> to vector<16x128xf32>
    %21 = arith.addf %18, %20 : vector<16x128xf32>
    %cst_17 = arith.constant 0.000000e+00 : f32
    %22 = vector.broadcast %cst_17 : f32 to vector<16x128xf32>
    %23 = arith.maximumf %21, %22 : vector<16x128xf32>
    %c0_18 = arith.constant 0 : index
    %c0_19 = arith.constant 0 : index
    %24 = vector.load %arg8[%c0_18, %c0_19] : memref<16x128xf32, #tpu.memory_space<vmem>>, vector<16x128xf32>
    tpu.vector_store %arg8[%c0_18, %c0_19], %23 {strides = array<i32>} : memref<16x128xf32, #tpu.memory_space<vmem>>, vector<16x128xf32>,
    return
  }
  func.func @transform_0(%arg0: i32) -> (i32, i32) {
    %c0_i32 = arith.constant 0 : i32
    %c0_i32_0 = arith.constant 0 : i32
    return %arg0, %c0_i32 : i32, i32
  }
  func.func @transform_1(%arg0: i32) -> (i32, i32) {
    %c0_i32 = arith.constant 0 : i32
    %c0_i32_0 = arith.constant 0 : i32
    %c0_i32_1 = arith.constant 0 : i32
    return %c0_i32, %c0_i32_0 : i32, i32
  }
  func.func @transform_2(%arg0: i32) -> (i32, i32) {
    %c0_i32 = arith.constant 0 : i32
    %c0_i32_0 = arith.constant 0 : i32
    %c0_i32_1 = arith.constant 0 : i32
    return %c0_i32, %c0_i32_0 : i32, i32
  }
  func.func @transform_3(%arg0: i32) -> (i32, i32) {
    %c0_i32 = arith.constant 0 : i32
    %c0_i32_0 = arith.constant 0 : i32
    %c0_i32_1 = arith.constant 0 : i32
    return %c0_i32, %c0_i32_0 : i32, i32
  }
  func.func @transform_4(%arg0: i32) -> (i32, i32) {
    %c0_i32 = arith.constant 0 : i32
    %c0_i32_0 = arith.constant 0 : i32
    %c0_i32_1 = arith.constant 0 : i32
    return %c0_i32, %c0_i32_0 : i32, i32
  }
  func.func @transform_5(%arg0: i32) -> (i32, i32) {
    %c0_i32 = arith.constant 0 : i32
    %c0_i32_0 = arith.constant 0 : i32
    %c0_i32_1 = arith.constant 0 : i32
    return %c0_i32, %c0_i32_0 : i32, i32
  }
  func.func @transform_6(%arg0: i32) -> (i32, i32) {
    %c0_i32 = arith.constant 0 : i32
    %c0_i32_0 = arith.constant 0 : i32
    %c0_i32_1 = arith.constant 0 : i32
    return %c0_i32, %c0_i32_0 : i32, i32
  }
  func.func @transform_7(%arg0: i32) -> (i32, i32) {
    %c0_i32 = arith.constant 0 : i32
    %c0_i32_0 = arith.constant 0 : i32
    return %arg0, %c0_i32 : i32, i32
  }
}

</mosaic_0001>

<bundles_post_ra>
// kernel: neural_network_forward.1
= control target key start
LH: loop header
LB: loop body
LE: loop exit
PB: predicated region body
PF: predicated region fallthrough
CT: control target
= control target key end

     0   :  { %12 = vsyncpa [#allocation3], 0  ;;  %s5514_s0 = inlined_call_operand.vmem [shape: bf16[16,896], index: 0, kind: input, shape index: {}]   ;;  %s5515_s1 = inlined_call_operand.hbm [shape: bf16[896,512], index: 1, kind: input, shape index: {}]   ;;  %s5516_s2 = inlined_call_operand.vmem [shape: f32[1,512], index: 2, kind: input, shape index: {}]   ;;  %s5517_s3 = inlined_call_operand.hbm [shape: bf16[512,512], index: 3, kind: input, shape index: {}]   ;;  %s5518_s4 = inlined_call_operand.vmem [shape: f32[1,512], index: 4, kind: input, shape index: {}]   ;;  %s5519_s5 = inlined_call_operand.vmem [shape: bf16[512,128], index: 5, kind: input, shape index: {}]   ;;  %s5520_s6 = inlined_call_operand.vmem [shape: f32[1,128], index: 6, kind: input, shape index: {}]   ;;  %s5521_s7 = inlined_call_operand.vmem [shape: f32[16,128], index: 7, kind: output, shape index: {}]  }
   0x1   :  { %s20_s26 = sshll.u32 %s5515_s1, 4  ;;  %s21_s26 = int_to_ptr.hbm [resolvable:$true] %s20_s26 }
   0x2   :  { %13 = vsyncpa [#allocation5], 0  ;;  %s5213_s27 = smov [#allocation2]   ;;  %s35_s8 = sshll.u32 %s5517_s3, 4  ;;  %s36_s8 = int_to_ptr.hbm [resolvable:$true] %s35_s8 }
   0x3   :  { %s22_s28 = sshll.u32 %s5213_s27, 4  ;;  %s5214_s9 = smov 256   ;;  %s23_s28 = int_to_ptr.vmem [resolvable:$true] %s22_s28 }
   0x4   :  { %s5215_s10 = smov 16   ;;  %s5216_s11 = smov [#allocation4]  }
   0x5   :  { %28 = dma.hbm_to_vmem [thread:$0]  %s21_s26, 28672, %s23_s28, [#allocation3], %s5214_s9, %s5214_s9, %s5215_s10  }
   0x6   :  { %s37_s12 = sshll.u32 %s5216_s11, 4  ;;  %s38_s12 = int_to_ptr.vmem [resolvable:$true] %s37_s12 }
   0x7   :  { %43 = dma.hbm_to_vmem [thread:$0]  %s36_s8, 16384, %s38_s12, [#allocation5], %s5214_s9, %s5214_s9, %s5215_s10  }
   0x8   :  { %5209 = dma.done.wait [#allocation3], 28672  }
   0x9   :  { %5210 = vsyncadd [#allocation3], 4294938624 }
   0xa   :  { %5211 = dma.done.wait [#allocation5], 16384  }
   0xb   :  { %5212 = vsyncadd [#allocation5], 4294950912  ;;  %v3342_v0 = vld [vmem:[#allocation2 + $0xe0] sm:$0xf]  ;;  %v4801_v1 = vld [vmem:[#allocation2 + $0xec] sm:$0xf0] }
   0xc   :  { %v3470_v2 = vld [vmem:[#allocation2 + $0x1e0] sm:$0xf]  ;;  %v3343_v3 = vor.u32 %v4801_v1, %v3342_v0  ;;  %v4833_v4 = vld [vmem:[#allocation2 + $0x1ec] sm:$0xf0] }
   0xd   :  { %v3598_v5 = vld [vmem:[#allocation2 + $0x2e0] sm:$0xf]  ;;  %v4865_v6 = vld [vmem:[#allocation2 + $0x2ec] sm:$0xf0]  ;;  %v3471_v7 = vor.u32 %v4833_v4, %v3470_v2 }
   0xe   :  { %v3599_v8 = vor.u32 %v4865_v6, %v3598_v5  ;;  %v3726_v9 = vld [vmem:[#allocation2 + $0x3e0] sm:$0xf]  ;;  %v4897_v10 = vld [vmem:[#allocation2 + $0x3ec] sm:$0xf0]  ;;  %1456 = vmatpush.bf16.msra.mxu0 %v3343_v3 }
   0xf   :  { %v3326_v11 = vld [vmem:[#allocation2 + $0xc0] sm:$0xf]  ;;  %v3727_v12 = vor.u32 %v4897_v10, %v3726_v9  ;;  %v4797_v13 = vld [vmem:[#allocation2 + $0xcc] sm:$0xf0]  ;;  %1470 = vmatpush.bf16.msra.mxu1 %v3471_v7 }
  0x10   :  { %v3454_v14 = vld [vmem:[#allocation2 + $0x1c0] sm:$0xf]  ;;  %v4829_v15 = vld [vmem:[#allocation2 + $0x1cc] sm:$0xf0]  ;;  %1484 = vmatpush.bf16.msra.mxu2 %v3599_v8  ;;  %v3327_v16 = vor.u32 %v4797_v13, %v3326_v11 }
  0x11   :  { %v3455_v17 = vor.u32 %v4829_v15, %v3454_v14  ;;  %v3582_v18 = vld [vmem:[#allocation2 + $0x2c0] sm:$0xf]  ;;  %v4861_v19 = vld [vmem:[#allocation2 + $0x2cc] sm:$0xf0]  ;;  %1498 = vmatpush.bf16.msra.mxu3 %v3727_v12 }
  0x12   :  { %v3710_v20 = vld [vmem:[#allocation2 + $0x3c0] sm:$0xf]  ;;  %v3583_v21 = vor.u32 %v4861_v19, %v3582_v18  ;;  %v4893_v22 = vld [vmem:[#allocation2 + $0x3cc] sm:$0xf0]  ;;  %1457 = vmatpush.bf16.msra.mxu0 %v3327_v16 }
  0x13   :  { %v3310_v23 = vld [vmem:[#allocation2 + $0xa0] sm:$0xf]  ;;  %v4793_v24 = vld [vmem:[#allocation2 + $0xac] sm:$0xf0]  ;;  %v3711_v25 = vor.u32 %v4893_v22, %v3710_v20  ;;  %1471 = vmatpush.bf16.msra.mxu1 %v3455_v17 }
  0x14   :  { %v3438_v26 = vld [vmem:[#allocation2 + $0x1a0] sm:$0xf]  ;;  %v4825_v27 = vld [vmem:[#allocation2 + $0x1ac] sm:$0xf0]  ;;  %v3311_v29 = vor.u32 %v4793_v24, %v3310_v23  ;;  %1485 = vmatpush.bf16.msra.mxu2 %v3583_v21 }
  0x15   :  { %v3566_v28 = vld [vmem:[#allocation2 + $0x2a0] sm:$0xf]  ;;  %v4857_v30 = vld [vmem:[#allocation2 + $0x2ac] sm:$0xf0]  ;;  %v3439_v33 = vor.u32 %v4825_v27, %v3438_v26  ;;  %1499 = vmatpush.bf16.msra.mxu3 %v3711_v25 }
  0x16   :  { %v3694_v31 = vld [vmem:[#allocation2 + $0x3a0] sm:$0xf]  ;;  %v4889_v32 = vld [vmem:[#allocation2 + $0x3ac] sm:$0xf0]  ;;  %v3567_v34 = vor.u32 %v4857_v30, %v3566_v28  ;;  %1458 = vmatpush.bf16.msra.mxu0 %v3311_v29 }
  0x17   :  { %v3294_v35 = vld [vmem:[#allocation2 + $0x80] sm:$0xf]  ;;  %v4789_v36 = vld [vmem:[#allocation2 + $0x8c] sm:$0xf0]  ;;  %v3695_v38 = vor.u32 %v4889_v32, %v3694_v31  ;;  %1472 = vmatpush.bf16.msra.mxu1 %v3439_v33 }
  0x18   :  { %v3422_v37 = vld [vmem:[#allocation2 + $0x180] sm:$0xf]  ;;  %v4821_v39 = vld [vmem:[#allocation2 + $0x18c] sm:$0xf0]  ;;  %v3295_v44 = vor.u32 %v4789_v36, %v3294_v35  ;;  %1486 = vmatpush.bf16.msra.mxu2 %v3567_v34 }
  0x19   :  { %v3550_v40 = vld [vmem:[#allocation2 + $0x280] sm:$0xf]  ;;  %v4853_v41 = vld [vmem:[#allocation2 + $0x28c] sm:$0xf0]  ;;  %v3423_v45 = vor.u32 %v4821_v39, %v3422_v37  ;;  %1500 = vmatpush.bf16.msra.mxu3 %v3695_v38  ;;  %v4799_v37 = vld [vmem:[#allocation2 + $0xe4] sm:$0xf] }
  0x1a   :  { %v3678_v42 = vld [vmem:[#allocation2 + $0x380] sm:$0xf]  ;;  %v4885_v43 = vld [vmem:[#allocation2 + $0x38c] sm:$0xf0]  ;;  %v3551_v46 = vor.u32 %v4853_v41, %v3550_v40  ;;  %1459 = vmatpush.bf16.msra.mxu0 %v3295_v44  ;;  %v3344_v38 = vld [vmem:[#allocation2 + $0xf0] sm:$0xf0] }
  0x1b   :  { %v3278_v47 = vld [vmem:[#allocation2 + $0x60] sm:$0xf]  ;;  %v4785_v48 = vld [vmem:[#allocation2 + $0x6c] sm:$0xf0]  ;;  %v3679_v50 = vor.u32 %v4885_v43, %v3678_v42  ;;  %1473 = vmatpush.bf16.msra.mxu1 %v3423_v45 }
  0x1c   :  { %v3406_v49 = vld [vmem:[#allocation2 + $0x160] sm:$0xf]  ;;  %v4817_v51 = vld [vmem:[#allocation2 + $0x16c] sm:$0xf0]  ;;  %v3279_v56 = vor.u32 %v4785_v48, %v3278_v47  ;;  %1487 = vmatpush.bf16.msra.mxu2 %v3551_v46  ;;  %v3347_v48 = vor.u32 %v4799_v37, %v3344_v38 }
  0x1d   :  { %v3534_v52 = vld [vmem:[#allocation2 + $0x260] sm:$0xf]  ;;  %v4849_v53 = vld [vmem:[#allocation2 + $0x26c] sm:$0xf0]  ;;  %v3407_v57 = vor.u32 %v4817_v51, %v3406_v49  ;;  %1501 = vmatpush.bf16.msra.mxu3 %v3679_v50  ;;  %v4795_v50 = vld [vmem:[#allocation2 + $0xc4] sm:$0xf] }
  0x1e   :  { %v3662_v54 = vld [vmem:[#allocation2 + $0x360] sm:$0xf]  ;;  %v4881_v55 = vld [vmem:[#allocation2 + $0x36c] sm:$0xf0]  ;;  %v3535_v58 = vor.u32 %v4849_v53, %v3534_v52  ;;  %1460 = vmatpush.bf16.msra.mxu0 %v3279_v56  ;;  %v3328_v51 = vld [vmem:[#allocation2 + $0xd0] sm:$0xf0] }
  0x1f   :  { %v3262_v59 = vld [vmem:[#allocation2 + $0x40] sm:$0xf]  ;;  %v4781_v60 = vld [vmem:[#allocation2 + $0x4c] sm:$0xf0]  ;;  %v3663_v62 = vor.u32 %v4881_v55, %v3662_v54  ;;  %1474 = vmatpush.bf16.msra.mxu1 %v3407_v57  ;;  %v4767_v53 = vld [vmem:[%s5514_s0 + $0x18] sm:$0xf0] }
  0x20   :  { %v3390_v61 = vld [vmem:[#allocation2 + $0x140] sm:$0xf]  ;;  %v4813_v63 = vld [vmem:[#allocation2 + $0x14c] sm:$0xf0]  ;;  %v3263_v4 = vor.u32 %v4781_v60, %v3262_v59  ;;  %1488 = vmatpush.bf16.msra.mxu2 %v3535_v58  ;;  %v3210_v54 = vld [vmem:[%s5514_s0 + $0x8] sm:$0xf] }
  0x21   :  { %v3518_v0 = vld [vmem:[#allocation2 + $0x240] sm:$0xf]  ;;  %v4845_v1 = vld [vmem:[#allocation2 + $0x24c] sm:$0xf0]  ;;  %v3391_v5 = vor.u32 %v4813_v63, %v3390_v61  ;;  %1502 = vmatpush.bf16.msra.mxu3 %v3663_v62  ;;  %v4768_v58 = vld [vmem:[%s5514_s0 + $0x20] sm:$0xf0] }
  0x22   :  { %v3646_v2 = vld [vmem:[#allocation2 + $0x340] sm:$0xf]  ;;  %v4877_v3 = vld [vmem:[#allocation2 + $0x34c] sm:$0xf0]  ;;  %v3519_v6 = vor.u32 %v4845_v1, %v3518_v0  ;;  %1461 = vmatpush.bf16.msra.mxu0 %v3263_v4  ;;  %v5277_v0 = vor.u32 %v4768_v58, %v3210_v54  ;;  %v3331_v1 = vor.u32 %v4795_v50, %v3328_v51  ;;  %v4791_v4 = vld [vmem:[#allocation2 + $0xa4] sm:$0xf] }
  0x23   :  { %v3246_v7 = vld [vmem:[#allocation2 + $0x20] sm:$0xf]  ;;  %v4777_v8 = vld [vmem:[#allocation2 + $0x2c] sm:$0xf0]  ;;  %v3647_v10 = vor.u32 %v4877_v3, %v3646_v2  ;;  %1475 = vmatpush.bf16.msra.mxu1 %v3391_v5  ;;  %v3312_v5 = vld [vmem:[#allocation2 + $0xb0] sm:$0xf0] }
  0x24   :  { %v3374_v9 = vld [vmem:[#allocation2 + $0x120] sm:$0xf]  ;;  %v4809_v11 = vld [vmem:[#allocation2 + $0x12c] sm:$0xf0]  ;;  %v3247_v16 = vor.u32 %v4777_v8, %v3246_v7  ;;  %1489 = vmatpush.bf16.msra.mxu2 %v3519_v6  ;;  %v4764_v6 = vld [vmem:[%s5514_s0 + $0x4] sm:$0xf] }
  0x25   :  { %v3502_v12 = vld [vmem:[#allocation2 + $0x220] sm:$0xf]  ;;  %v4841_v13 = vld [vmem:[#allocation2 + $0x22c] sm:$0xf0]  ;;  %v3375_v19 = vor.u32 %v4809_v11, %v3374_v9  ;;  %1503 = vmatpush.bf16.msra.mxu3 %v3647_v10 }
  0x26   :  { %v3630_v14 = vld [vmem:[#allocation2 + $0x320] sm:$0xf]  ;;  %v4873_v15 = vld [vmem:[#allocation2 + $0x32c] sm:$0xf0]  ;;  %v3503_v20 = vor.u32 %v4841_v13, %v3502_v12  ;;  %1462 = vmatpush.bf16.msra.mxu0 %v3247_v16 }
  0x27   :  { %v3230_v17 = vld [vmem:[#allocation2] sm:$0xf]  ;;  %v4773_v18 = vld [vmem:[#allocation2 + $0xc] sm:$0xf0]  ;;  %v3631_v24 = vor.u32 %v4873_v15, %v3630_v14  ;;  %1476 = vmatpush.bf16.msra.mxu1 %v3375_v19  ;;  %v4765_v19 = vld [vmem:[%s5514_s0 + $0xc] sm:$0xf] }
  0x28   :  { %v3358_v21 = vld [vmem:[#allocation2 + $0x100] sm:$0xf]  ;;  %v4805_v22 = vld [vmem:[#allocation2 + $0x10c] sm:$0xf0]  ;;  %v3231_v31 = vor.u32 %v4773_v18, %v3230_v17  ;;  %1490 = vmatpush.bf16.msra.mxu2 %v3503_v20  ;;  %v3315_v17 = vor.u32 %v4791_v4, %v3312_v5  ;;  %v3212_v20 = vld [vmem:[%s5514_s0 + $0x24] sm:$0xf0] }
  0x29   :  { %v3486_v23 = vld [vmem:[#allocation2 + $0x200] sm:$0xf]  ;;  %v4837_v25 = vld [vmem:[#allocation2 + $0x20c] sm:$0xf0]  ;;  %v3359_v35 = vor.u32 %v4805_v22, %v3358_v21  ;;  %1504 = vmatpush.bf16.msra.mxu3 %v3631_v24  ;;  %v4787_v21 = vld [vmem:[#allocation2 + $0x84] sm:$0xf] }
  0x2a   :  { %v3614_v26 = vld [vmem:[#allocation2 + $0x300] sm:$0xf]  ;;  %v4869_v27 = vld [vmem:[#allocation2 + $0x30c] sm:$0xf0]  ;;  %v3487_v36 = vor.u32 %v4837_v25, %v3486_v23  ;;  %1463 = vmatpush.bf16.msra.mxu0 %v3231_v31  ;;  %v3296_v22 = vld [vmem:[#allocation2 + $0x90] sm:$0xf0]  ;;  %v5296_v23 = vor.u32 %v4765_v19, %v3212_v20 }
  0x2b   :  { %v3854_v28 = vld [vmem:[#allocation2 + $0x4e0] sm:$0xf]  ;;  %v4929_v29 = vld [vmem:[#allocation2 + $0x4ec] sm:$0xf0]  ;;  %v3615_v39 = vor.u32 %v4869_v27, %v3614_v26  ;;  %1477 = vmatpush.bf16.msra.mxu1 %v3359_v35  ;;  %v3280_v35 = vld [vmem:[#allocation2 + $0x70] sm:$0xf0] }
  0x2c   :  { %v3982_v30 = vld [vmem:[#allocation2 + $0x5e0] sm:$0xf]  ;;  %v4961_v32 = vld [vmem:[#allocation2 + $0x5ec] sm:$0xf0]  ;;  %v3855_v40 = vor.u32 %v4929_v29, %v3854_v28  ;;  %1491 = vmatpush.bf16.msra.mxu2 %v3487_v36  ;;  %v3856_v19 = vld [vmem:[#allocation2 + $0x4f0] sm:$0xf0] }
  0x2d   :  { %v4110_v33 = vld [vmem:[#allocation2 + $0x6e0] sm:$0xf]  ;;  %v4993_v34 = vld [vmem:[#allocation2 + $0x6ec] sm:$0xf0]  ;;  %v3983_v43 = vor.u32 %v4961_v32, %v3982_v30  ;;  %1505 = vmatpush.bf16.msra.mxu3 %v3615_v39  ;;  %v3299_v30 = vor.u32 %v4787_v21, %v3296_v22 }
  0x2e   :  { %v3838_v41 = vld [vmem:[#allocation2 + $0x4c0] sm:$0xf]  ;;  %v4925_v42 = vld [vmem:[#allocation2 + $0x4cc] sm:$0xf0]  ;;  %v4111_v44 = vor.u32 %v4993_v34, %v4110_v33  ;;  %1512 = vmatpush.bf16.msrb.mxu0 %v3855_v40  ;;  %v4783_v34 = vld [vmem:[#allocation2 + $0x64] sm:$0xf] }
  0x2f   :  { %v3966_v45 = vld [vmem:[#allocation2 + $0x5c0] sm:$0xf]  ;;  %v4957_v46 = vld [vmem:[#allocation2 + $0x5cc] sm:$0xf0]  ;;  %v3839_v55 = vor.u32 %v4925_v42, %v3838_v41  ;;  %1526 = vmatpush.bf16.msrb.mxu1 %v3983_v43  ;;  %1492 = vmatmul.bf16.vlgmr.msra.gmra.mxu2 %v5277_v0  ;;  %v3283_v42 = vor.u32 %v4783_v34, %v3280_v35  ;;  %v3456_v34 = vld [vmem:[#allocation2 + $0x1d0] sm:$0xf0] }
  0x30   :  { %v4094_v47 = vld [vmem:[#allocation2 + $0x6c0] sm:$0xf]  ;;  %v4989_v49 = vld [vmem:[#allocation2 + $0x6cc] sm:$0xf0]  ;;  %1540 = vmatpush.bf16.msrb.mxu2 %v4111_v44  ;;  %v3967_v59 = vor.u32 %v4957_v46, %v3966_v45  ;;  %1506 = vmatmul.bf16.vlgmr.msra.gmra.mxu3 %v5296_v23  ;;  %v4779_v46 = vld [vmem:[#allocation2 + $0x44] sm:$0xf] }
  0x31   :  { %v3202_v52 = vld [vmem:[%s5514_s0] sm:$0xf]  ;;  %v4095_v60 = vor.u32 %v4989_v49, %v4094_v47  ;;  %v4921_v61 = vld [vmem:[#allocation2 + $0x4ac] sm:$0xf0]  ;;  %1554 = vmatpush.bf16.msrb.mxu3 %v3347_v48  ;;  %v3264_v47 = vld [vmem:[#allocation2 + $0x50] sm:$0xf0] }
  0x32   :  { %v3822_v56 = vld [vmem:[#allocation2 + $0x4a0] sm:$0xf]  ;;  %v5272_v57 = vor.u32 %v4767_v53, %v3202_v52  ;;  %v4953_v63 = vld [vmem:[#allocation2 + $0x5ac] sm:$0xf0]  ;;  %1513 = vmatpush.bf16.msrb.mxu0 %v3839_v55  ;;  %v3267_v54 = vor.u32 %v4779_v46, %v3264_v47  ;;  %v4859_v35 = vld [vmem:[#allocation2 + $0x2c4] sm:$0xf] }
  0x33   :  { %v3950_v62 = vld [vmem:[#allocation2 + $0x5a0] sm:$0xf]  ;;  %v4985_v3 = vld [vmem:[#allocation2 + $0x6ac] sm:$0xf0]  ;;  %v3823_v8 = vor.u32 %v4921_v61, %v3822_v56  ;;  %1527 = vmatpush.bf16.msrb.mxu1 %v3967_v59  ;;  %v4775_v59 = vld [vmem:[#allocation2 + $0x24] sm:$0xf] }
  0x34   :  { %v4078_v2 = vld [vmem:[#allocation2 + $0x6a0] sm:$0xf]  ;;  %1464 = vmatmul.bf16.vlgmr.msra.gmra.mxu0 %v5272_v57  ;;  %v4917_v10 = vld [vmem:[#allocation2 + $0x48c] sm:$0xf0]  ;;  %1541 = vmatpush.bf16.msrb.mxu2 %v4095_v60  ;;  %v3951_v12 = vor.u32 %v4953_v63, %v3950_v62  ;;  %v3248_v60 = vld [vmem:[#allocation2 + $0x30] sm:$0xf0] }
  0x35   :  { %v3204_v7 = vld [vmem:[%s5514_s0 + $0x1c] sm:$0xf0]  ;;  %v4079_v13 = vor.u32 %v4985_v3, %v4078_v2  ;;  %v4949_v15 = vld [vmem:[#allocation2 + $0x58c] sm:$0xf0]  ;;  %1555 = vmatpush.bf16.msrb.mxu3 %v3331_v1 }
  0x36   :  { %v3806_v9 = vld [vmem:[#allocation2 + $0x480] sm:$0xf]  ;;  %v5287_v11 = vor.u32 %v4764_v6, %v3204_v7  ;;  %v4981_v18 = vld [vmem:[#allocation2 + $0x68c] sm:$0xf0]  ;;  %1514 = vmatpush.bf16.msrb.mxu0 %v3823_v8  ;;  %v4771_v7 = vld [vmem:[#allocation2 + $0x4] sm:$0xf]  ;;  %v3251_v8 = vor.u32 %v4775_v59, %v3248_v60 }
  0x37   :  { %v3934_v14 = vld [vmem:[#allocation2 + $0x580] sm:$0xf]  ;;  %v3807_v24 = vor.u32 %v4917_v10, %v3806_v9  ;;  %1528 = vmatpush.bf16.msrb.mxu1 %v3951_v12  ;;  %v4913_v28 = vld [vmem:[#allocation2 + $0x46c] sm:$0xf0]  ;;  %v3232_v9 = vld [vmem:[#allocation2 + $0x10] sm:$0xf0] }
  0x38   :  { %v4062_v16 = vld [vmem:[#allocation2 + $0x680] sm:$0xf]  ;;  %1478 = vmatmul.bf16.vlgmr.msra.gmra.mxu1 %v5287_v11  ;;  %1542 = vmatpush.bf16.msrb.mxu2 %v4079_v13  ;;  %v3935_v25 = vor.u32 %v4949_v15, %v3934_v14  ;;  %v4945_v31 = vld [vmem:[#allocation2 + $0x56c] sm:$0xf0]  ;;  %v4831_v10 = vld [vmem:[#allocation2 + $0x1e4] sm:$0xf] }
  0x39   :  { %v4063_v26 = vor.u32 %v4981_v18, %v4062_v16  ;;  %v3790_v27 = vld [vmem:[#allocation2 + $0x460] sm:$0xf]  ;;  %1556 = vmatpush.bf16.msrb.mxu3 %v3315_v17  ;;  %v4977_v33 = vld [vmem:[#allocation2 + $0x66c] sm:$0xf0]  ;;  %v3472_v12 = vld [vmem:[#allocation2 + $0x1f0] sm:$0xf0] }
  0x3a   :  { %v3918_v29 = vld [vmem:[#allocation2 + $0x560] sm:$0xf]  ;;  %1515 = vmatpush.bf16.msrb.mxu0 %v3807_v24  ;;  %v3791_v36 = vor.u32 %v4913_v28, %v3790_v27  ;;  %v4909_v40 = vld [vmem:[#allocation2 + $0x44c] sm:$0xf0]  ;;  %v4863_v13 = vld [vmem:[#allocation2 + $0x2e4] sm:$0xf]  ;;  %v3475_v27 = vor.u32 %v4831_v10, %v3472_v12 }
  0x3b   :  { %v4046_v32 = vld [vmem:[#allocation2 + $0x660] sm:$0xf]  ;;  %1529 = vmatpush.bf16.msrb.mxu1 %v3935_v25  ;;  %v3919_v37 = vor.u32 %v4945_v31, %v3918_v29  ;;  %v4941_v43 = vld [vmem:[#allocation2 + $0x54c] sm:$0xf0]  ;;  %v3600_v14 = vld [vmem:[#allocation2 + $0x2f0] sm:$0xf0] }
  0x3c   :  { %1543 = vmatpush.bf16.msrb.mxu2 %v4063_v26  ;;  %v4047_v38 = vor.u32 %v4977_v33, %v4046_v32  ;;  %v3774_v39 = vld [vmem:[#allocation2 + $0x440] sm:$0xf]  ;;  %v4973_v45 = vld [vmem:[#allocation2 + $0x64c] sm:$0xf0]  ;;  %v4895_v15 = vld [vmem:[#allocation2 + $0x3e4] sm:$0xf]  ;;  %v3235_v26 = vor.u32 %v4771_v7, %v3232_v9  ;;  %v3603_v31 = vor.u32 %v4863_v13, %v3600_v14 }
  0x3d   :  { %v3902_v41 = vld [vmem:[#allocation2 + $0x540] sm:$0xf]  ;;  %1557 = vmatpush.bf16.msrb.mxu3 %v3299_v30  ;;  %v3775_v48 = vor.u32 %v4909_v40, %v3774_v39  ;;  %v4905_v52 = vld [vmem:[#allocation2 + $0x42c] sm:$0xf0]  ;;  %v3728_v17 = vld [vmem:[#allocation2 + $0x3f0] sm:$0xf0] }
  0x3e   :  { %v4030_v44 = vld [vmem:[#allocation2 + $0x640] sm:$0xf]  ;;  %1516 = vmatpush.bf16.msrb.mxu0 %v3791_v36  ;;  %v3903_v49 = vor.u32 %v4941_v43, %v3902_v41  ;;  %v4937_v55 = vld [vmem:[#allocation2 + $0x52c] sm:$0xf0]  ;;  %v4927_v18 = vld [vmem:[#allocation2 + $0x4e4] sm:$0xf]  ;;  %v3731_v32 = vor.u32 %v4895_v15, %v3728_v17 }
  0x3f   :  { %1530 = vmatpush.bf16.msrb.mxu1 %v3919_v37  ;;  %v4031_v50 = vor.u32 %v4973_v45, %v4030_v44  ;;  %v3758_v51 = vld [vmem:[#allocation2 + $0x420] sm:$0xf]  ;;  %v4969_v58 = vld [vmem:[#allocation2 + $0x62c] sm:$0xf0]  ;;  %v4769_v24 = vld [vmem:[%s5514_s0 + $0x28] sm:$0xf0]  ;;  %v3859_v36 = vor.u32 %v4927_v18, %v3856_v19 }
  0x40   :  { %1544 = vmatpush.bf16.msrb.mxu2 %v4047_v38  ;;  %v3886_v53 = vld [vmem:[#allocation2 + $0x520] sm:$0xf]  ;;  %v3759_v62 = vor.u32 %v4905_v52, %v3758_v51  ;;  %v4901_v63 = vld [vmem:[#allocation2 + $0x40c] sm:$0xf0]  ;;  %v3226_v25 = vld [vmem:[%s5514_s0 + $0x18] sm:$0xf] }
  0x41   :  { %1558 = vmatpush.bf16.msrb.mxu3 %v3283_v42  ;;  %v4014_v56 = vld [vmem:[#allocation2 + $0x620] sm:$0xf]  ;;  %v4933_v2 = vld [vmem:[#allocation2 + $0x50c] sm:$0xf0]  ;;  %v3887_v3 = vor.u32 %v4937_v55, %v3886_v53  ;;  %v4770_v28 = vld [vmem:[%s5514_s0 + $0x30] sm:$0xf0] }
  0x42   :  { %v3742_v61 = vld [vmem:[#allocation2 + $0x400] sm:$0xf]  ;;  %1517 = vmatpush.bf16.msrb.mxu0 %v3775_v48  ;;  %v4015_v4 = vor.u32 %v4969_v58, %v4014_v56  ;;  %v4965_v6 = vld [vmem:[#allocation2 + $0x60c] sm:$0xf0]  ;;  %v4766_v29 = vld [vmem:[%s5514_s0 + $0x14] sm:$0xf]  ;;  %v5319_v41 = vor.u32 %v4770_v28, %v3226_v25 }
  0x43   :  { %v3870_v1 = vld [vmem:[#allocation2 + $0x500] sm:$0xf]  ;;  %1531 = vmatpush.bf16.msrb.mxu1 %v3903_v49  ;;  %v3743_v16 = vor.u32 %v4901_v63, %v3742_v61  ;;  %v3218_v22 = vld [vmem:[%s5514_s0 + $0x10] sm:$0xf]  ;;  %v4827_v33 = vld [vmem:[#allocation2 + $0x1c4] sm:$0xf] }
  0x44   :  { %1545 = vmatpush.bf16.msrb.mxu2 %v4031_v50  ;;  %v3998_v5 = vld [vmem:[#allocation2 + $0x600] sm:$0xf]  ;;  %v3871_v20 = vor.u32 %v4933_v2, %v3870_v1  ;;  %v3220_v30 = vld [vmem:[%s5514_s0 + $0x2c] sm:$0xf0]  ;;  %v5317_v37 = vor.u32 %v4769_v24, %v3218_v22  ;;  %v3584_v38 = vld [vmem:[#allocation2 + $0x2d0] sm:$0xf0]  ;;  %v3459_v45 = vor.u32 %v4827_v33, %v3456_v34 }
  0x45   :  { %1559 = vmatpush.bf16.msrb.mxu3 %v3267_v54  ;;  %v3999_v21 = vor.u32 %v4965_v6, %v3998_v5  ;;  %v4891_v39 = vld [vmem:[#allocation2 + $0x3c4] sm:$0xf]  ;;  %v3712_v40 = vld [vmem:[#allocation2 + $0x3d0] sm:$0xf0]  ;;  %v5321_v42 = vor.u32 %v4766_v29, %v3220_v30  ;;  %v3587_v46 = vor.u32 %v4859_v35, %v3584_v38 }
  0x46   :  { %1518 = vmatpush.bf16.msrb.mxu0 %v3759_v62  ;;  %v4923_v43 = vld [vmem:[#allocation2 + $0x4c4] sm:$0xf]  ;;  %v3840_v44 = vld [vmem:[#allocation2 + $0x4d0] sm:$0xf0]  ;;  %v3715_v47 = vor.u32 %v4891_v39, %v3712_v40 }
  0x47   :  { %1532 = vmatpush.bf16.msrb.mxu1 %v3887_v3  ;;  %v4823_v48 = vld [vmem:[#allocation2 + $0x1a4] sm:$0xf]  ;;  %v3440_v49 = vld [vmem:[#allocation2 + $0x1b0] sm:$0xf0]  ;;  %v3843_v51 = vor.u32 %v4923_v43, %v3840_v44 }
  0x48   :  { %1546 = vmatpush.bf16.msrb.mxu2 %v4015_v4  ;;  %v4855_v50 = vld [vmem:[#allocation2 + $0x2a4] sm:$0xf]  ;;  %v3568_v52 = vld [vmem:[#allocation2 + $0x2b0] sm:$0xf0]  ;;  %v3443_v58 = vor.u32 %v4823_v48, %v3440_v49 }
  0x49   :  { %1560 = vmatpush.bf16.msrb.mxu3 %v3251_v8  ;;  %v4887_v53 = vld [vmem:[#allocation2 + $0x3a4] sm:$0xf]  ;;  %v3696_v54 = vld [vmem:[#allocation2 + $0x3b0] sm:$0xf0]  ;;  %v3571_v59 = vor.u32 %v4855_v50, %v3568_v52 }
  0x4a   :  { %1519 = vmatpush.bf16.msrb.mxu0 %v3743_v16  ;;  %v4919_v55 = vld [vmem:[#allocation2 + $0x4a4] sm:$0xf]  ;;  %v3824_v56 = vld [vmem:[#allocation2 + $0x4b0] sm:$0xf0]  ;;  %v3699_v60 = vor.u32 %v4887_v53, %v3696_v54 }
  0x4b   :  { %1533 = vmatpush.bf16.msrb.mxu1 %v3871_v20  ;;  %v4819_v61 = vld [vmem:[#allocation2 + $0x184] sm:$0xf]  ;;  %v3424_v62 = vld [vmem:[#allocation2 + $0x190] sm:$0xf0]  ;;  %v3827_v1 = vor.u32 %v4919_v55, %v3824_v56 }
  0x4c   :  { %1547 = vmatpush.bf16.msrb.mxu2 %v3999_v21  ;;  %v4851_v63 = vld [vmem:[#allocation2 + $0x284] sm:$0xf]  ;;  %v3552_v2 = vld [vmem:[#allocation2 + $0x290] sm:$0xf0]  ;;  %v3427_v7 = vor.u32 %v4819_v61, %v3424_v62 }
  0x4d   :  { %1561 = vmatpush.bf16.msrb.mxu3 %v3235_v26  ;;  %1520 = vmatmul.bf16.vlgmr.msrb.gmra.mxu0 %v5317_v37  ;;  %v4883_v3 = vld [vmem:[#allocation2 + $0x384] sm:$0xf]  ;;  %v3680_v4 = vld [vmem:[#allocation2 + $0x390] sm:$0xf0]  ;;  %v3555_v8 = vor.u32 %v4851_v63, %v3552_v2 }
  0x4e   :  { %1568 = vmatpush.bf16.msra.mxu0 %v3475_v27  ;;  %1534 = vmatmul.bf16.vlgmr.msrb.gmra.mxu1 %v5321_v42  ;;  %v4915_v5 = vld [vmem:[#allocation2 + $0x484] sm:$0xf]  ;;  %v3808_v6 = vld [vmem:[#allocation2 + $0x490] sm:$0xf0]  ;;  %v3683_v9 = vor.u32 %v4883_v3, %v3680_v4  ;;  %v3350_v3 = vld [vmem:[#allocation2 + $0xe8] sm:$0xf] }
  0x4f   :  { %1582 = vmatpush.bf16.msra.mxu1 %v3603_v31  ;;  %1548 = vmatmul.bf16.vlgmr.msrb.gmra.mxu2 %v5319_v41  ;;  %v4815_v10 = vld [vmem:[#allocation2 + $0x164] sm:$0xf]  ;;  %v3408_v12 = vld [vmem:[#allocation2 + $0x170] sm:$0xf0]  ;;  %v3811_v14 = vor.u32 %v4915_v5, %v3808_v6  ;;  %v4802_v4 = vld [vmem:[#allocation2 + $0xf4] sm:$0xf0] }
  0x50   :  { %1596 = vmatpush.bf16.msra.mxu2 %v3731_v32  ;;  %1562 = vmatmul.bf16.vlgmr.msrb.gmra.mxu3 %v5272_v57  ;;  %v4847_v13 = vld [vmem:[#allocation2 + $0x264] sm:$0xf]  ;;  %v3536_v15 = vld [vmem:[#allocation2 + $0x270] sm:$0xf0]  ;;  %v3411_v20 = vor.u32 %v4815_v10, %v3408_v12 }
  0x51   :  { %1610 = vmatpush.bf16.msra.mxu3 %v3859_v36  ;;  %v4879_v16 = vld [vmem:[#allocation2 + $0x364] sm:$0xf]  ;;  %v3664_v17 = vld [vmem:[#allocation2 + $0x370] sm:$0xf0]  ;;  %v3539_v21 = vor.u32 %v4847_v13, %v3536_v15  ;;  %v3351_v13 = vor.u32 %v4802_v4, %v3350_v3 }
  0x52   :  { %1569 = vmatpush.bf16.msra.mxu0 %v3459_v45  ;;  %v4911_v18 = vld [vmem:[#allocation2 + $0x464] sm:$0xf]  ;;  %v3792_v19 = vld [vmem:[#allocation2 + $0x470] sm:$0xf0]  ;;  %v3667_v22 = vor.u32 %v4879_v16, %v3664_v17 }
  0x53   :  { %1583 = vmatpush.bf16.msra.mxu1 %v3587_v46  ;;  %v4811_v24 = vld [vmem:[#allocation2 + $0x144] sm:$0xf]  ;;  %v3392_v25 = vld [vmem:[#allocation2 + $0x150] sm:$0xf0]  ;;  %v3795_v27 = vor.u32 %v4911_v18, %v3792_v19  ;;  %v3334_v19 = vld [vmem:[#allocation2 + $0xc8] sm:$0xf] }
  0x54   :  { %1597 = vmatpush.bf16.msra.mxu2 %v3715_v47  ;;  %v4843_v26 = vld [vmem:[#allocation2 + $0x244] sm:$0xf]  ;;  %v3520_v28 = vld [vmem:[#allocation2 + $0x250] sm:$0xf0]  ;;  %v3395_v33 = vor.u32 %v4811_v24, %v3392_v25 }
  0x55   :  { %1611 = vmatpush.bf16.msra.mxu3 %v3843_v51  ;;  %v4875_v29 = vld [vmem:[#allocation2 + $0x344] sm:$0xf]  ;;  %v3648_v30 = vld [vmem:[#allocation2 + $0x350] sm:$0xf0]  ;;  %v3523_v34 = vor.u32 %v4843_v26, %v3520_v28 }
  0x56   :  { %1570 = vmatpush.bf16.msra.mxu0 %v3443_v58  ;;  %v4907_v31 = vld [vmem:[#allocation2 + $0x444] sm:$0xf]  ;;  %v3776_v32 = vld [vmem:[#allocation2 + $0x450] sm:$0xf0]  ;;  %v3651_v35 = vor.u32 %v4875_v29, %v3648_v30 }
  0x57   :  { %1584 = vmatpush.bf16.msra.mxu1 %v3571_v59  ;;  %v4807_v36 = vld [vmem:[#allocation2 + $0x124] sm:$0xf]  ;;  %v3376_v38 = vld [vmem:[#allocation2 + $0x130] sm:$0xf0]  ;;  %v3779_v40 = vor.u32 %v4907_v31, %v3776_v32  ;;  %v3318_v32 = vld [vmem:[#allocation2 + $0xa8] sm:$0xf] }
  0x58   :  { %1598 = vmatpush.bf16.msra.mxu2 %v3699_v60  ;;  %v4839_v39 = vld [vmem:[#allocation2 + $0x224] sm:$0xf]  ;;  %v3504_v43 = vld [vmem:[#allocation2 + $0x230] sm:$0xf0]  ;;  %v3379_v48 = vor.u32 %v4807_v36, %v3376_v38 }
  0x59   :  { %1612 = vmatpush.bf16.msra.mxu3 %v3827_v1  ;;  %v4871_v44 = vld [vmem:[#allocation2 + $0x324] sm:$0xf]  ;;  %v3632_v45 = vld [vmem:[#allocation2 + $0x330] sm:$0xf0]  ;;  %v3507_v51 = vor.u32 %v4839_v39, %v3504_v43 }
  0x5a   :  { %1571 = vmatpush.bf16.msra.mxu0 %v3427_v7  ;;  %v4903_v46 = vld [vmem:[#allocation2 + $0x424] sm:$0xf]  ;;  %v3760_v47 = vld [vmem:[#allocation2 + $0x430] sm:$0xf0]  ;;  %v3635_v52 = vor.u32 %v4871_v44, %v3632_v45  ;;  %v3478_v7 = vld [vmem:[#allocation2 + $0x1e8] sm:$0xf] }
  0x5b   :  { %1585 = vmatpush.bf16.msra.mxu1 %v3555_v8  ;;  %v4803_v49 = vld [vmem:[#allocation2 + $0x104] sm:$0xf]  ;;  %v3360_v50 = vld [vmem:[#allocation2 + $0x110] sm:$0xf0]  ;;  %v3763_v56 = vor.u32 %v4903_v46, %v3760_v47  ;;  %v4834_v8 = vld [vmem:[#allocation2 + $0x1f4] sm:$0xf0] }
  0x5c   :  { %1599 = vmatpush.bf16.msra.mxu2 %v3683_v9  ;;  %v4835_v53 = vld [vmem:[#allocation2 + $0x204] sm:$0xf]  ;;  %v3488_v54 = vld [vmem:[#allocation2 + $0x210] sm:$0xf0]  ;;  %v3363_v1 = vor.u32 %v4803_v49, %v3360_v50  ;;  %v3479_v17 = vor.u32 %v4834_v8, %v3478_v7  ;;  %v3302_v47 = vld [vmem:[#allocation2 + $0x88] sm:$0xf] }
  0x5d   :  { %1613 = vmatpush.bf16.msra.mxu3 %v3811_v14  ;;  %v4867_v55 = vld [vmem:[#allocation2 + $0x304] sm:$0xf]  ;;  %v3616_v58 = vld [vmem:[#allocation2 + $0x310] sm:$0xf0]  ;;  %v3491_v5 = vor.u32 %v4835_v53, %v3488_v54  ;;  %v3430_v49 = vld [vmem:[#allocation2 + $0x188] sm:$0xf] }
  0x5e   :  { %1572 = vmatpush.bf16.msra.mxu0 %v3411_v20  ;;  %v4899_v59 = vld [vmem:[#allocation2 + $0x404] sm:$0xf]  ;;  %v3744_v60 = vld [vmem:[#allocation2 + $0x410] sm:$0xf0]  ;;  %v3619_v6 = vor.u32 %v4867_v55, %v3616_v58  ;;  %v4798_v20 = vld [vmem:[#allocation2 + $0xd4] sm:$0xf0] }
  0x5f   :  { %1586 = vmatpush.bf16.msra.mxu1 %v3539_v21  ;;  %v4959_v61 = vld [vmem:[#allocation2 + $0x5e4] sm:$0xf]  ;;  %v3984_v62 = vld [vmem:[#allocation2 + $0x5f0] sm:$0xf0]  ;;  %v3747_v9 = vor.u32 %v4899_v59, %v3744_v60  ;;  %v3462_v21 = vld [vmem:[#allocation2 + $0x1c8] sm:$0xf]  ;;  %v3335_v26 = vor.u32 %v4798_v20, %v3334_v19 }
  0x60   :  { %1600 = vmatpush.bf16.msra.mxu2 %v3667_v22  ;;  %v4991_v63 = vld [vmem:[#allocation2 + $0x6e4] sm:$0xf]  ;;  %v4112_v2 = vld [vmem:[#allocation2 + $0x6f0] sm:$0xf0]  ;;  %v3987_v10 = vor.u32 %v4959_v61, %v3984_v62  ;;  %v4830_v22 = vld [vmem:[#allocation2 + $0x1d4] sm:$0xf0] }
  0x61   :  { %1614 = vmatpush.bf16.msra.mxu3 %v3795_v27  ;;  %v4115_v12 = vor.u32 %v4991_v63, %v4112_v2  ;;  %v4955_v14 = vld [vmem:[#allocation2 + $0x5c4] sm:$0xf]  ;;  %v3968_v15 = vld [vmem:[#allocation2 + $0x5d0] sm:$0xf0]  ;;  %v3463_v30 = vor.u32 %v4830_v22, %v3462_v21  ;;  %v4822_v50 = vld [vmem:[#allocation2 + $0x194] sm:$0xf0] }
  0x62   :  { %1573 = vmatpush.bf16.msra.mxu0 %v3395_v33  ;;  %v4987_v16 = vld [vmem:[#allocation2 + $0x6c4] sm:$0xf]  ;;  %v4096_v18 = vld [vmem:[#allocation2 + $0x6d0] sm:$0xf0]  ;;  %v3971_v24 = vor.u32 %v4955_v14, %v3968_v15  ;;  %v4794_v33 = vld [vmem:[#allocation2 + $0xb4] sm:$0xf0]  ;;  %v3431_v58 = vor.u32 %v4822_v50, %v3430_v49 }
  0x63   :  { %1587 = vmatpush.bf16.msra.mxu1 %v3523_v34  ;;  %v4099_v25 = vor.u32 %v4987_v16, %v4096_v18  ;;  %v4951_v27 = vld [vmem:[#allocation2 + $0x5a4] sm:$0xf]  ;;  %v3952_v28 = vld [vmem:[#allocation2 + $0x5b0] sm:$0xf0]  ;;  %v3446_v34 = vld [vmem:[#allocation2 + $0x1a8] sm:$0xf]  ;;  %v3319_v39 = vor.u32 %v4794_v33, %v3318_v32 }
  0x64   :  { %1601 = vmatpush.bf16.msra.mxu2 %v3651_v35  ;;  %v4983_v29 = vld [vmem:[#allocation2 + $0x6a4] sm:$0xf]  ;;  %v4080_v31 = vld [vmem:[#allocation2 + $0x6b0] sm:$0xf0]  ;;  %v4826_v35 = vld [vmem:[#allocation2 + $0x1b4] sm:$0xf0]  ;;  %v3955_v36 = vor.u32 %v4951_v27, %v3952_v28 }
  0x65   :  { %1615 = vmatpush.bf16.msra.mxu3 %v3779_v40  ;;  %v4083_v38 = vor.u32 %v4983_v29, %v4080_v31  ;;  %v4947_v40 = vld [vmem:[#allocation2 + $0x584] sm:$0xf]  ;;  %v3936_v43 = vld [vmem:[#allocation2 + $0x590] sm:$0xf0]  ;;  %v3447_v45 = vor.u32 %v4826_v35, %v3446_v34  ;;  %v3286_v60 = vld [vmem:[#allocation2 + $0x68] sm:$0xf] }
  0x66   :  { %1574 = vmatpush.bf16.msra.mxu0 %v3379_v48  ;;  %v4979_v44 = vld [vmem:[#allocation2 + $0x684] sm:$0xf]  ;;  %v4064_v46 = vld [vmem:[#allocation2 + $0x690] sm:$0xf0]  ;;  %v4790_v48 = vld [vmem:[#allocation2 + $0x94] sm:$0xf0] }
  0x67   :  { %1588 = vmatpush.bf16.msra.mxu1 %v3507_v51  ;;  %v3939_v51 = vor.u32 %v4947_v40, %v3936_v43  ;;  %v3303_v53 = vor.u32 %v4790_v48, %v3302_v47  ;;  %v4943_v54 = vld [vmem:[#allocation2 + $0x564] sm:$0xf]  ;;  %v3920_v55 = vld [vmem:[#allocation2 + $0x570] sm:$0xf0]  ;;  %v4786_v61 = vld [vmem:[#allocation2 + $0x74] sm:$0xf0] }
  0x68   :  { %1602 = vmatpush.bf16.msra.mxu2 %v3635_v52  ;;  %v4067_v52 = vor.u32 %v4979_v44, %v4064_v46  ;;  %v4048_v59 = vld [vmem:[#allocation2 + $0x670] sm:$0xf0]  ;;  %v3414_v62 = vld [vmem:[#allocation2 + $0x168] sm:$0xf]  ;;  %v4818_v63 = vld [vmem:[#allocation2 + $0x174] sm:$0xf0]  ;;  %v3287_v3 = vor.u32 %v4786_v61, %v3286_v60 }
  0x69   :  { %1616 = vmatpush.bf16.msra.mxu3 %v3763_v56  ;;  %v4975_v56 = vld [vmem:[#allocation2 + $0x664] sm:$0xf]  ;;  %v3415_v7 = vor.u32 %v4818_v63, %v3414_v62  ;;  %v4032_v8 = vld [vmem:[#allocation2 + $0x650] sm:$0xf0]  ;;  %v3254_v22 = vld [vmem:[#allocation2 + $0x28] sm:$0xf] }
  0x6a   :  { %1575 = vmatpush.bf16.msra.mxu0 %v3363_v1  ;;  %v3923_v1 = vor.u32 %v4943_v54, %v3920_v55  ;;  %v4051_v2 = vor.u32 %v4975_v56, %v4048_v59  ;;  %v4939_v4 = vld [vmem:[#allocation2 + $0x544] sm:$0xf]  ;;  %v3888_v18 = vld [vmem:[#allocation2 + $0x530] sm:$0xf0]  ;;  %v3238_v34 = vld [vmem:[#allocation2 + $0x8] sm:$0xf] }
  0x6b   :  { %1589 = vmatpush.bf16.msra.mxu1 %v3491_v5  ;;  %v3904_v5 = vld [vmem:[#allocation2 + $0x550] sm:$0xf0]  ;;  %v4967_v19 = vld [vmem:[#allocation2 + $0x624] sm:$0xf]  ;;  %v3606_v40 = vld [vmem:[#allocation2 + $0x2e8] sm:$0xf] }
  0x6c   :  { %1603 = vmatpush.bf16.msra.mxu2 %v3619_v6  ;;  %v4971_v6 = vld [vmem:[#allocation2 + $0x644] sm:$0xf]  ;;  %v3907_v14 = vor.u32 %v4939_v4, %v3904_v5  ;;  %v4016_v21 = vld [vmem:[#allocation2 + $0x630] sm:$0xf0]  ;;  %v4866_v43 = vld [vmem:[#allocation2 + $0x2f4] sm:$0xf0] }
  0x6d   :  { %1617 = vmatpush.bf16.msra.mxu3 %v3747_v9  ;;  %1576 = vmatmul.bf16.vlgmr.msra.gmra.mxu0 %v5287_v11  ;;  %v3270_v9 = vld [vmem:[#allocation2 + $0x48] sm:$0xf]  ;;  %v4035_v15 = vor.u32 %v4971_v6, %v4032_v8  ;;  %v4931_v28 = vld [vmem:[#allocation2 + $0x504] sm:$0xf]  ;;  %v3872_v29 = vld [vmem:[#allocation2 + $0x510] sm:$0xf0]  ;;  %v3607_v54 = vor.u32 %v4866_v43, %v3606_v40 }
  0x6e   :  { %1624 = vmatpush.bf16.msrb.mxu0 %v3987_v10  ;;  %1590 = vmatmul.bf16.vlgmr.msra.gmra.mxu1 %v5277_v0  ;;  %v4782_v10 = vld [vmem:[#allocation2 + $0x54] sm:$0xf0]  ;;  %v4963_v32 = vld [vmem:[#allocation2 + $0x604] sm:$0xf]  ;;  %v4000_v33 = vld [vmem:[#allocation2 + $0x610] sm:$0xf0] }
  0x6f   :  { %1638 = vmatpush.bf16.msrb.mxu1 %v4115_v12  ;;  %1604 = vmatmul.bf16.vlgmr.msra.gmra.mxu2 %v5296_v23  ;;  %v3398_v12 = vld [vmem:[#allocation2 + $0x148] sm:$0xf]  ;;  %v3271_v16 = vor.u32 %v4782_v10, %v3270_v9  ;;  %v4898_v46 = vld [vmem:[#allocation2 + $0x3f4] sm:$0xf0]  ;;  %v4003_v49 = vor.u32 %v4963_v32, %v4000_v33 }
  0x70   :  { %1652 = vmatpush.bf16.msrb.mxu2 %v3351_v13  ;;  %1618 = vmatmul.bf16.vlgmr.msra.gmra.mxu3 %v5317_v37  ;;  %v4814_v13 = vld [vmem:[#allocation2 + $0x154] sm:$0xf0]  ;;  %v3734_v44 = vld [vmem:[#allocation2 + $0x3e8] sm:$0xf] }
  0x71   :  { %1666 = vmatpush.bf16.msrb.mxu3 %v3479_v17  ;;  %v4935_v17 = vld [vmem:[#allocation2 + $0x524] sm:$0xf]  ;;  %v3399_v20 = vor.u32 %v4814_v13, %v3398_v12  ;;  %v3862_v47 = vld [vmem:[#allocation2 + $0x4e8] sm:$0xf]  ;;  %v4930_v48 = vld [vmem:[#allocation2 + $0x4f4] sm:$0xf0]  ;;  %v3735_v55 = vor.u32 %v4898_v46, %v3734_v44 }
  0x72   :  { %1625 = vmatpush.bf16.msrb.mxu0 %v3971_v24  ;;  %v4778_v24 = vld [vmem:[#allocation2 + $0x34] sm:$0xf0]  ;;  %v3891_v27 = vor.u32 %v4935_v17, %v3888_v18  ;;  %v3863_v56 = vor.u32 %v4930_v48, %v3862_v47  ;;  %v3718_v60 = vld [vmem:[#allocation2 + $0x3c8] sm:$0xf] }
  0x73   :  { %1639 = vmatpush.bf16.msrb.mxu1 %v4099_v25  ;;  %v3382_v25 = vld [vmem:[#allocation2 + $0x128] sm:$0xf]  ;;  %v3255_v31 = vor.u32 %v4778_v24, %v3254_v22  ;;  %v4862_v59 = vld [vmem:[#allocation2 + $0x2d4] sm:$0xf0] }
  0x74   :  { %1653 = vmatpush.bf16.msrb.mxu2 %v3335_v26  ;;  %v4810_v26 = vld [vmem:[#allocation2 + $0x134] sm:$0xf0]  ;;  %v3846_v63 = vld [vmem:[#allocation2 + $0x4c8] sm:$0xf] }
  0x75   :  { %1667 = vmatpush.bf16.msrb.mxu3 %v3463_v30  ;;  %v4019_v30 = vor.u32 %v4967_v19, %v4016_v21  ;;  %v3383_v35 = vor.u32 %v4810_v26, %v3382_v25  ;;  %v4894_v62 = vld [vmem:[#allocation2 + $0x3d4] sm:$0xf0]  ;;  %v3702_v9 = vld [vmem:[#allocation2 + $0x3a8] sm:$0xf] }
  0x76   :  { %1626 = vmatpush.bf16.msrb.mxu0 %v3955_v36  ;;  %v4774_v36 = vld [vmem:[#allocation2 + $0x14] sm:$0xf0]  ;;  %v3719_v5 = vor.u32 %v4894_v62, %v3718_v60  ;;  %v3830_v13 = vld [vmem:[#allocation2 + $0x4a8] sm:$0xf] }
  0x77   :  { %1640 = vmatpush.bf16.msrb.mxu1 %v4083_v38  ;;  %v3366_v38 = vld [vmem:[#allocation2 + $0x108] sm:$0xf]  ;;  %v3239_v50 = vor.u32 %v4774_v36, %v3238_v34  ;;  %v4858_v8 = vld [vmem:[#allocation2 + $0x2b4] sm:$0xf0] }
  0x78   :  { %1654 = vmatpush.bf16.msrb.mxu2 %v3319_v39  ;;  %v4806_v39 = vld [vmem:[#allocation2 + $0x114] sm:$0xf0]  ;;  %v3686_v22 = vld [vmem:[#allocation2 + $0x388] sm:$0xf] }
  0x79   :  { %1668 = vmatpush.bf16.msrb.mxu3 %v3447_v45  ;;  %v3875_v45 = vor.u32 %v4931_v28, %v3872_v29  ;;  %v4890_v12 = vld [vmem:[#allocation2 + $0x3b4] sm:$0xf0]  ;;  %v3814_v26 = vld [vmem:[#allocation2 + $0x488] sm:$0xf] }
  0x7a   :  { %1627 = vmatpush.bf16.msrb.mxu0 %v3939_v51  ;;  %v3990_v51 = vld [vmem:[#allocation2 + $0x5e8] sm:$0xf]  ;;  %v3703_v18 = vor.u32 %v4890_v12, %v3702_v9  ;;  %v4854_v21 = vld [vmem:[#allocation2 + $0x294] sm:$0xf0] }
  0x7b   :  { %1641 = vmatpush.bf16.msrb.mxu1 %v4067_v52  ;;  %v4962_v52 = vld [vmem:[#allocation2 + $0x5f4] sm:$0xf0]  ;;  %v3942_v28 = vld [vmem:[#allocation2 + $0x588] sm:$0xf] }
  0x7c   :  { %1655 = vmatpush.bf16.msrb.mxu2 %v3303_v53  ;;  %v3367_v53 = vor.u32 %v4806_v39, %v3366_v38  ;;  %v3991_v61 = vor.u32 %v4962_v52, %v3990_v51  ;;  %v4886_v25 = vld [vmem:[#allocation2 + $0x394] sm:$0xf0]  ;;  %v3542_v33 = vld [vmem:[#allocation2 + $0x268] sm:$0xf] }
  0x7d   :  { %1669 = vmatpush.bf16.msrb.mxu3 %v3431_v58  ;;  %v3590_v58 = vld [vmem:[#allocation2 + $0x2c8] sm:$0xf]  ;;  %v4950_v29 = vld [vmem:[#allocation2 + $0x594] sm:$0xf0] }
  0x7e   :  { %1628 = vmatpush.bf16.msrb.mxu0 %v3923_v1  ;;  %v4926_v1 = vld [vmem:[#allocation2 + $0x4d4] sm:$0xf0]  ;;  %v3591_v4 = vor.u32 %v4862_v59, %v3590_v58  ;;  %v3943_v36 = vor.u32 %v4950_v29, %v3942_v28  ;;  %v3798_v39 = vld [vmem:[#allocation2 + $0x468] sm:$0xf] }
  0x7f   :  { %1642 = vmatpush.bf16.msrb.mxu1 %v4051_v2  ;;  %v3974_v2 = vld [vmem:[#allocation2 + $0x5c8] sm:$0xf]  ;;  %v3847_v6 = vor.u32 %v4926_v1, %v3846_v63  ;;  %v4850_v34 = vld [vmem:[#allocation2 + $0x274] sm:$0xf0] }
  0x80   :  { %1656 = vmatpush.bf16.msrb.mxu2 %v3287_v3  ;;  %v4958_v3 = vld [vmem:[#allocation2 + $0x5d4] sm:$0xf0]  ;;  %v3926_v43 = vld [vmem:[#allocation2 + $0x568] sm:$0xf] }
  0x81   :  { %1670 = vmatpush.bf16.msrb.mxu3 %v3415_v7  ;;  %v3574_v7 = vld [vmem:[#allocation2 + $0x2a8] sm:$0xf]  ;;  %v3975_v10 = vor.u32 %v4958_v3, %v3974_v2  ;;  %v4882_v38 = vld [vmem:[#allocation2 + $0x374] sm:$0xf0] }
  0x82   :  { %1629 = vmatpush.bf16.msrb.mxu0 %v3907_v14  ;;  %v4922_v14 = vld [vmem:[#allocation2 + $0x4b4] sm:$0xf0]  ;;  %v3575_v17 = vor.u32 %v4858_v8, %v3574_v7  ;;  %v3526_v48 = vld [vmem:[#allocation2 + $0x248] sm:$0xf] }
  0x83   :  { %1643 = vmatpush.bf16.msrb.mxu1 %v4035_v15  ;;  %v3958_v15 = vld [vmem:[#allocation2 + $0x5a8] sm:$0xf]  ;;  %v3831_v19 = vor.u32 %v4922_v14, %v3830_v13  ;;  %v4914_v40 = vld [vmem:[#allocation2 + $0x474] sm:$0xf0] }
  0x84   :  { %1657 = vmatpush.bf16.msrb.mxu2 %v3271_v16  ;;  %v4954_v16 = vld [vmem:[#allocation2 + $0x5b4] sm:$0xf0]  ;;  %v3799_v47 = vor.u32 %v4914_v40, %v3798_v39  ;;  %v3638_v63 = vld [vmem:[#allocation2 + $0x328] sm:$0xf]  ;;  %v4796_v39 = vld [vmem:[#allocation2 + $0xcc] sm:$0xf] }
  0x85   :  { %1671 = vmatpush.bf16.msrb.mxu3 %v3399_v20  ;;  %v3558_v20 = vld [vmem:[#allocation2 + $0x288] sm:$0xf]  ;;  %v3959_v24 = vor.u32 %v4954_v16, %v3958_v15  ;;  %v4946_v44 = vld [vmem:[#allocation2 + $0x574] sm:$0xf0] }
  0x86   :  { %1630 = vmatpush.bf16.msrb.mxu0 %v3891_v27  ;;  %v4918_v27 = vld [vmem:[#allocation2 + $0x494] sm:$0xf0]  ;;  %v3927_v51 = vor.u32 %v4946_v44, %v3926_v43  ;;  %v3766_v3 = vld [vmem:[#allocation2 + $0x428] sm:$0xf]  ;;  %v3336_v43 = vld [vmem:[#allocation2 + $0xd8] sm:$0xf0] }
  0x87   :  { %1644 = vmatpush.bf16.msrb.mxu1 %v4019_v30  ;;  %v3559_v30 = vor.u32 %v4854_v21, %v3558_v20  ;;  %v3815_v32 = vor.u32 %v4918_v27, %v3814_v26  ;;  %v4878_v52 = vld [vmem:[#allocation2 + $0x354] sm:$0xf0]  ;;  %v3494_v8 = vld [vmem:[#allocation2 + $0x208] sm:$0xf]  ;;  %v4832_v26 = vld [vmem:[#allocation2 + $0x1ec] sm:$0xf] }
  0x88   :  { %1658 = vmatpush.bf16.msrb.mxu2 %v3255_v31  ;;  %v3687_v31 = vor.u32 %v4886_v25, %v3686_v22  ;;  %v4842_v62 = vld [vmem:[#allocation2 + $0x234] sm:$0xf0]  ;;  %v3622_v13 = vld [vmem:[#allocation2 + $0x308] sm:$0xf]  ;;  %v4800_v22 = vld [vmem:[#allocation2 + $0xec] sm:$0xf] }
  0x89   :  { %1672 = vmatpush.bf16.msrb.mxu3 %v3383_v35  ;;  %v3670_v35 = vld [vmem:[#allocation2 + $0x368] sm:$0xf]  ;;  %v4874_v2 = vld [vmem:[#allocation2 + $0x334] sm:$0xf0]  ;;  %v3352_v25 = vld [vmem:[#allocation2 + $0xf8] sm:$0xf0] }
  0x8a   :  { %1631 = vmatpush.bf16.msrb.mxu0 %v3875_v45  ;;  %v3543_v45 = vor.u32 %v4850_v34, %v3542_v33  ;;  %v3671_v46 = vor.u32 %v4882_v38, %v3670_v35  ;;  %v4838_v9 = vld [vmem:[#allocation2 + $0x214] sm:$0xf0]  ;;  %v3750_v15 = vld [vmem:[#allocation2 + $0x408] sm:$0xf]  ;;  %v3480_v27 = vld [vmem:[#allocation2 + $0x1f8] sm:$0xf0]  ;;  %v3355_v34 = vor.u32 %v4800_v22, %v3352_v25 }
  0x8b   :  { %1645 = vmatpush.bf16.msrb.mxu1 %v4003_v49  ;;  %v4846_v49 = vld [vmem:[#allocation2 + $0x254] sm:$0xf0]  ;;  %v4118_v20 = vld [vmem:[#allocation2 + $0x6e8] sm:$0xf]  ;;  %v3483_v35 = vor.u32 %v4832_v26, %v3480_v27  ;;  %v4828_v44 = vld [vmem:[#allocation2 + $0x1cc] sm:$0xf] }
  0x8c   :  { %1659 = vmatpush.bf16.msrb.mxu2 %v3239_v50  ;;  %v3654_v50 = vld [vmem:[#allocation2 + $0x348] sm:$0xf]  ;;  %v3527_v58 = vor.u32 %v4846_v49, %v3526_v48  ;;  %v4870_v14 = vld [vmem:[#allocation2 + $0x314] sm:$0xf0]  ;;  %v3339_v49 = vor.u32 %v4796_v39, %v3336_v43  ;;  %v3544_v22 = vld [vmem:[#allocation2 + $0x278] sm:$0xf0] }
  0x8d   :  { %1673 = vmatpush.bf16.msrb.mxu3 %v3367_v53  ;;  %1632 = vmatmul.bf16.vlgmr.msrb.gmra.mxu0 %v5321_v42  ;;  %v3782_v53 = vld [vmem:[#allocation2 + $0x448] sm:$0xf]  ;;  %v3655_v59 = vor.u32 %v4878_v52, %v3654_v50  ;;  %v4994_v21 = vld [vmem:[#allocation2 + $0x6f4] sm:$0xf0]  ;;  %v3623_v28 = vor.u32 %v4870_v14, %v3622_v13 }
  0x8e   :  { %1680 = vmatpush.bf16.msra.mxu0 %v3607_v54  ;;  %1646 = vmatmul.bf16.vlgmr.msrb.gmra.mxu1 %v5319_v41  ;;  %v4910_v54 = vld [vmem:[#allocation2 + $0x454] sm:$0xf0]  ;;  %v4119_v33 = vor.u32 %v4994_v21, %v4118_v20  ;;  %v4054_v14 = vld [vmem:[#allocation2 + $0x668] sm:$0xf]  ;;  %v3416_v20 = vld [vmem:[#allocation2 + $0x178] sm:$0xf0] }
  0x8f   :  { %1694 = vmatpush.bf16.msra.mxu1 %v3735_v55  ;;  %1660 = vmatmul.bf16.vlgmr.msrb.gmra.mxu2 %v5272_v57  ;;  %v3910_v55 = vld [vmem:[#allocation2 + $0x548] sm:$0xf]  ;;  %v3783_v60 = vor.u32 %v4910_v54, %v3782_v53  ;;  %v4990_v38 = vld [vmem:[#allocation2 + $0x6d4] sm:$0xf0]  ;;  %v4792_v53 = vld [vmem:[#allocation2 + $0xac] sm:$0xf] }
  0x90   :  { %1708 = vmatpush.bf16.msra.mxu2 %v3863_v56  ;;  %1674 = vmatmul.bf16.vlgmr.msrb.gmra.mxu3 %v5287_v11  ;;  %v4942_v56 = vld [vmem:[#allocation2 + $0x554] sm:$0xf0]  ;;  %v4848_v21 = vld [vmem:[#allocation2 + $0x26c] sm:$0xf]  ;;  %v4038_v27 = vld [vmem:[#allocation2 + $0x648] sm:$0xf] }
  0x91   :  { %1722 = vmatpush.bf16.msra.mxu3 %v3991_v61  ;;  %v3510_v61 = vld [vmem:[#allocation2 + $0x228] sm:$0xf]  ;;  %v3911_v1 = vor.u32 %v4942_v56, %v3910_v55  ;;  %v4986_v52 = vld [vmem:[#allocation2 + $0x6b4] sm:$0xf0]  ;;  %v3320_v55 = vld [vmem:[#allocation2 + $0xb8] sm:$0xf0] }
  0x92   :  { %1681 = vmatpush.bf16.msra.mxu0 %v3591_v4  ;;  %v4906_v4 = vld [vmem:[#allocation2 + $0x434] sm:$0xf0]  ;;  %v3511_v7 = vor.u32 %v4842_v62, %v3510_v61  ;;  %v4824_v56 = vld [vmem:[#allocation2 + $0x1ac] sm:$0xf]  ;;  %v3323_v62 = vor.u32 %v4792_v53, %v3320_v55 }
  0x93   :  { %1695 = vmatpush.bf16.msra.mxu1 %v3719_v5  ;;  %v3894_v5 = vld [vmem:[#allocation2 + $0x528] sm:$0xf]  ;;  %v3767_v12 = vor.u32 %v4906_v4, %v3766_v3  ;;  %v4788_v3 = vld [vmem:[#allocation2 + $0x8c] sm:$0xf]  ;;  %v4970_v43 = vld [vmem:[#allocation2 + $0x634] sm:$0xf0] }
  0x94   :  { %1709 = vmatpush.bf16.msra.mxu2 %v3847_v6  ;;  %v4938_v6 = vld [vmem:[#allocation2 + $0x534] sm:$0xf0] }
  0x95   :  { %1723 = vmatpush.bf16.msra.mxu3 %v3975_v10  ;;  %v3639_v10 = vor.u32 %v4874_v2, %v3638_v63  ;;  %v3895_v16 = vor.u32 %v4938_v6, %v3894_v5  ;;  %v4982_v2 = vld [vmem:[#allocation2 + $0x694] sm:$0xf0]  ;;  %v3304_v5 = vld [vmem:[#allocation2 + $0x98] sm:$0xf0]  ;;  %v4820_v6 = vld [vmem:[#allocation2 + $0x18c] sm:$0xf] }
  0x96   :  { %1682 = vmatpush.bf16.msra.mxu0 %v3575_v17  ;;  %v4902_v17 = vld [vmem:[#allocation2 + $0x414] sm:$0xf0] }
  0x97   :  { %1696 = vmatpush.bf16.msra.mxu1 %v3703_v18  ;;  %v3878_v18 = vld [vmem:[#allocation2 + $0x508] sm:$0xf]  ;;  %v3751_v29 = vor.u32 %v4902_v17, %v3750_v15  ;;  %v4978_v15 = vld [vmem:[#allocation2 + $0x674] sm:$0xf0] }
  0x98   :  { %1710 = vmatpush.bf16.msra.mxu2 %v3831_v19  ;;  %v4934_v19 = vld [vmem:[#allocation2 + $0x514] sm:$0xf0] }
  0x99   :  { %1724 = vmatpush.bf16.msra.mxu3 %v3959_v24  ;;  %v3495_v24 = vor.u32 %v4838_v9, %v3494_v8  ;;  %v4852_v8 = vld [vmem:[#allocation2 + $0x28c] sm:$0xf]  ;;  %v3560_v9 = vld [vmem:[#allocation2 + $0x298] sm:$0xf0]  ;;  %v4966_v53 = vld [vmem:[#allocation2 + $0x614] sm:$0xf0] }
  0x9a   :  { %1683 = vmatpush.bf16.msra.mxu0 %v3559_v30  ;;  %v4864_v30 = vld [vmem:[#allocation2 + $0x2ec] sm:$0xf]  ;;  %v3563_v17 = vor.u32 %v4852_v8, %v3560_v9 }
  0x9b   :  { %1697 = vmatpush.bf16.msra.mxu1 %v3687_v31  ;;  %v3608_v31 = vld [vmem:[#allocation2 + $0x2f8] sm:$0xf0] }
  0x9c   :  { %1711 = vmatpush.bf16.msra.mxu2 %v3815_v32  ;;  %v3879_v32 = vor.u32 %v4934_v19, %v3878_v18  ;;  %v3611_v40 = vor.u32 %v4864_v30, %v3608_v31  ;;  %v3288_v18 = vld [vmem:[#allocation2 + $0x78] sm:$0xf0]  ;;  %v4816_v19 = vld [vmem:[#allocation2 + $0x16c] sm:$0xf]  ;;  %v3547_v30 = vor.u32 %v4848_v21, %v3544_v22 }
  0x9d   :  { %1725 = vmatpush.bf16.msra.mxu3 %v3943_v36  ;;  %v4102_v36 = vld [vmem:[#allocation2 + $0x6c8] sm:$0xf]  ;;  %v3419_v26 = vor.u32 %v4816_v19, %v3416_v20  ;;  %v3272_v31 = vld [vmem:[#allocation2 + $0x58] sm:$0xf0]  ;;  %v4924_v19 = vld [vmem:[#allocation2 + $0x4cc] sm:$0xf] }
  0x9e   :  { %1684 = vmatpush.bf16.msra.mxu0 %v3543_v45  ;;  %v3464_v45 = vld [vmem:[#allocation2 + $0x1d8] sm:$0xf0]  ;;  %v4103_v48 = vor.u32 %v4990_v38, %v4102_v36  ;;  %v4956_v22 = vld [vmem:[#allocation2 + $0x5cc] sm:$0xf] }
  0x9f   :  { %1698 = vmatpush.bf16.msra.mxu1 %v3671_v46  ;;  %v4860_v46 = vld [vmem:[#allocation2 + $0x2cc] sm:$0xf]  ;;  %v3467_v50 = vor.u32 %v4828_v44, %v3464_v45  ;;  %v3848_v21 = vld [vmem:[#allocation2 + $0x4d8] sm:$0xf0] }
  0xa0   :  { %1712 = vmatpush.bf16.msra.mxu2 %v3799_v47  ;;  %v3592_v47 = vld [vmem:[#allocation2 + $0x2d8] sm:$0xf0]  ;;  %v4776_v44 = vld [vmem:[#allocation2 + $0x2c] sm:$0xf] }
  0xa1   :  { %1726 = vmatpush.bf16.msra.mxu3 %v3927_v51  ;;  %v4086_v51 = vld [vmem:[#allocation2 + $0x6a8] sm:$0xf]  ;;  %v3595_v54 = vor.u32 %v4860_v46, %v3592_v47  ;;  %v3256_v46 = vld [vmem:[#allocation2 + $0x38] sm:$0xf0]  ;;  %v4808_v47 = vld [vmem:[#allocation2 + $0x12c] sm:$0xf] }
  0xa2   :  { %1685 = vmatpush.bf16.msra.mxu0 %v3527_v58  ;;  %v3448_v58 = vld [vmem:[#allocation2 + $0x1b8] sm:$0xf0]  ;;  %v4087_v61 = vor.u32 %v4986_v52, %v4086_v51  ;;  %v4006_v52 = vld [vmem:[#allocation2 + $0x608] sm:$0xf] }
  0xa3   :  { %1699 = vmatpush.bf16.msra.mxu1 %v3655_v59  ;;  %v4856_v59 = vld [vmem:[#allocation2 + $0x2ac] sm:$0xf]  ;;  %v3451_v63 = vor.u32 %v4824_v56, %v3448_v58  ;;  %v3240_v58 = vld [vmem:[#allocation2 + $0x18] sm:$0xf0] }
  0xa4   :  { %1713 = vmatpush.bf16.msra.mxu2 %v3783_v60  ;;  %v3576_v60 = vld [vmem:[#allocation2 + $0x2b8] sm:$0xf0]  ;;  %v4772_v56 = vld [vmem:[#allocation2 + $0xc] sm:$0xf] }
  0xa5   :  { %1727 = vmatpush.bf16.msra.mxu3 %v3911_v1  ;;  %v4070_v1 = vld [vmem:[#allocation2 + $0x688] sm:$0xf]  ;;  %v3579_v4 = vor.u32 %v4856_v59, %v3576_v60  ;;  %v4804_v59 = vld [vmem:[#allocation2 + $0x10c] sm:$0xf]  ;;  %v3243_v8 = vor.u32 %v4772_v56, %v3240_v58 }
  0xa6   :  { %1686 = vmatpush.bf16.msra.mxu0 %v3511_v7  ;;  %v3432_v7 = vld [vmem:[#allocation2 + $0x198] sm:$0xf0]  ;;  %v4912_v56 = vld [vmem:[#allocation2 + $0x46c] sm:$0xf] }
  0xa7   :  { %1700 = vmatpush.bf16.msra.mxu1 %v3639_v10  ;;  %v4071_v10 = vor.u32 %v4982_v2, %v4070_v1  ;;  %v3435_v13 = vor.u32 %v4820_v6, %v3432_v7  ;;  %v4896_v1 = vld [vmem:[#allocation2 + $0x3ec] sm:$0xf]  ;;  %v3736_v2 = vld [vmem:[#allocation2 + $0x3f8] sm:$0xf0] }
  0xa8   :  { %1714 = vmatpush.bf16.msra.mxu2 %v3767_v12  ;;  %v3307_v12 = vor.u32 %v4788_v3, %v3304_v5  ;;  %v4928_v3 = vld [vmem:[#allocation2 + $0x4ec] sm:$0xf]  ;;  %v3864_v5 = vld [vmem:[#allocation2 + $0x4f8] sm:$0xf0] }
  0xa9   :  { %1728 = vmatpush.bf16.msra.mxu3 %v3895_v16  ;;  %v4784_v16 = vld [vmem:[#allocation2 + $0x6c] sm:$0xf]  ;;  %v3992_v7 = vld [vmem:[#allocation2 + $0x5f8] sm:$0xf0] }
  0xaa   :  { %1687 = vmatpush.bf16.msra.mxu0 %v3495_v24  ;;  %v4055_v24 = vor.u32 %v4978_v15, %v4054_v14  ;;  %v3291_v25 = vor.u32 %v4784_v16, %v3288_v18  ;;  %v4960_v6 = vld [vmem:[#allocation2 + $0x5ec] sm:$0xf]  ;;  %v3739_v14 = vor.u32 %v4896_v1, %v3736_v2  ;;  %v3867_v15 = vor.u32 %v4928_v3, %v3864_v5  ;;  %v3720_v18 = vld [vmem:[#allocation2 + $0x3d8] sm:$0xf0] }
  0xab   :  { %1701 = vmatpush.bf16.msra.mxu1 %v3623_v28  ;;  %v4974_v28 = vld [vmem:[#allocation2 + $0x654] sm:$0xf0]  ;;  %v3995_v16 = vor.u32 %v4960_v6, %v3992_v7  ;;  %v4056_v1 = vld [vmem:[#allocation2 + $0x678] sm:$0xf0]  ;;  %v4876_v6 = vld [vmem:[#allocation2 + $0x34c] sm:$0xf] }
  0xac   :  { %1715 = vmatpush.bf16.msra.mxu2 %v3751_v29  ;;  %v4780_v29 = vld [vmem:[#allocation2 + $0x4c] sm:$0xf]  ;;  %v4039_v36 = vor.u32 %v4974_v28, %v4038_v27  ;;  %v3851_v28 = vor.u32 %v4924_v19, %v3848_v21  ;;  %v3656_v7 = vld [vmem:[#allocation2 + $0x358] sm:$0xf0] }
  0xad   :  { %1729 = vmatpush.bf16.msra.mxu3 %v3879_v32  ;;  %1688 = vmatmul.bf16.vlgmr.msra.gmra.mxu0 %v5277_v0  ;;  %v4812_v32 = vld [vmem:[#allocation2 + $0x14c] sm:$0xf]  ;;  %v3275_v38 = vor.u32 %v4780_v29, %v3272_v31  ;;  %v3704_v31 = vld [vmem:[#allocation2 + $0x3b8] sm:$0xf0] }
  0xae   :  { %1736 = vmatpush.bf16.msrb.mxu0 %v4119_v33  ;;  %1702 = vmatmul.bf16.vlgmr.msra.gmra.mxu1 %v5296_v23  ;;  %v3400_v33 = vld [vmem:[#allocation2 + $0x158] sm:$0xf0]  ;;  %v4872_v19 = vld [vmem:[#allocation2 + $0x32c] sm:$0xf] }
  0xaf   :  { %1750 = vmatpush.bf16.msrb.mxu1 %v3355_v34  ;;  %1716 = vmatmul.bf16.vlgmr.msra.gmra.mxu2 %v5317_v37  ;;  %v4844_v34 = vld [vmem:[#allocation2 + $0x24c] sm:$0xf]  ;;  %v3403_v39 = vor.u32 %v4812_v32, %v3400_v33 }
  0xb0   :  { %1764 = vmatpush.bf16.msrb.mxu2 %v3483_v35  ;;  %1730 = vmatmul.bf16.vlgmr.msra.gmra.mxu3 %v5321_v42  ;;  %v3528_v35 = vld [vmem:[#allocation2 + $0x258] sm:$0xf0]  ;;  %v4920_v32 = vld [vmem:[#allocation2 + $0x4ac] sm:$0xf] }
  0xb1   :  { %1778 = vmatpush.bf16.msrb.mxu3 %v3611_v40  ;;  %v4022_v40 = vld [vmem:[#allocation2 + $0x628] sm:$0xf]  ;;  %v3531_v45 = vor.u32 %v4844_v34, %v3528_v35  ;;  %v3832_v34 = vld [vmem:[#allocation2 + $0x4b8] sm:$0xf0]  ;;  %v4952_v35 = vld [vmem:[#allocation2 + $0x5ac] sm:$0xf] }
  0xb2   :  { %1737 = vmatpush.bf16.msrb.mxu0 %v4103_v48  ;;  %v3384_v48 = vld [vmem:[#allocation2 + $0x138] sm:$0xf0]  ;;  %v4023_v51 = vor.u32 %v4970_v43, %v4022_v40  ;;  %v3835_v43 = vor.u32 %v4920_v32, %v3832_v34  ;;  %v4904_v21 = vld [vmem:[#allocation2 + $0x42c] sm:$0xf] }
  0xb3   :  { %1751 = vmatpush.bf16.msrb.mxu1 %v3339_v49  ;;  %v4840_v49 = vld [vmem:[#allocation2 + $0x22c] sm:$0xf]  ;;  %v3387_v55 = vor.u32 %v4808_v47, %v3384_v48 }
  0xb4   :  { %1765 = vmatpush.bf16.msrb.mxu2 %v3467_v50  ;;  %v3512_v50 = vld [vmem:[#allocation2 + $0x238] sm:$0xf0]  ;;  %v4916_v47 = vld [vmem:[#allocation2 + $0x48c] sm:$0xf] }
  0xb5   :  { %1779 = vmatpush.bf16.msrb.mxu3 %v3595_v54  ;;  %v3259_v54 = vor.u32 %v4776_v44, %v3256_v46  ;;  %v3515_v60 = vor.u32 %v4840_v49, %v3512_v50  ;;  %v3688_v46 = vld [vmem:[#allocation2 + $0x398] sm:$0xf0]  ;;  %v4948_v50 = vld [vmem:[#allocation2 + $0x58c] sm:$0xf]  ;;  %v5345_v2 = vpop.f32.mrf.mxu1 }
  0xb6   :  { %1738 = vmatpush.bf16.msrb.mxu0 %v4087_v61  ;;  %v3368_v61 = vld [vmem:[#allocation2 + $0x118] sm:$0xf0]  ;;  %v4868_v32 = vld [vmem:[#allocation2 + $0x30c] sm:$0xf] }
  0xb7   :  { %1752 = vmatpush.bf16.msrb.mxu1 %v3323_v62  ;;  %v4836_v62 = vld [vmem:[#allocation2 + $0x20c] sm:$0xf]  ;;  %v3371_v9 = vor.u32 %v4804_v59, %v3368_v61  ;;  %v3816_v49 = vld [vmem:[#allocation2 + $0x498] sm:$0xf0] }
  0xb8   :  { %1766 = vmatpush.bf16.msrb.mxu2 %v3451_v63  ;;  %v3496_v63 = vld [vmem:[#allocation2 + $0x218] sm:$0xf0] }
  0xb9   :  { %1780 = vmatpush.bf16.msrb.mxu3 %v3579_v4  ;;  %v4007_v4 = vor.u32 %v4966_v53, %v4006_v52  ;;  %v4072_v52 = vld [vmem:[#allocation2 + $0x698] sm:$0xf0]  ;;  %v3819_v53 = vor.u32 %v4916_v47, %v3816_v49  ;;  %v5354_v47 = vpop.f32.mrf.mxu3  ;;  %v4238_v49 = vld [vmem:[#allocation4 + $0xe0] sm:$0xf] }
  0xba   :  { %1739 = vmatpush.bf16.msrb.mxu0 %v4071_v10  ;;  %v4992_v10 = vld [vmem:[#allocation2 + $0x6ec] sm:$0xf]  ;;  %v3800_v59 = vld [vmem:[#allocation2 + $0x478] sm:$0xf0] }
  0xbb   :  { %1753 = vmatpush.bf16.msrb.mxu1 %v3307_v12  ;;  %v4120_v12 = vld [vmem:[#allocation2 + $0x6f8] sm:$0xf0] }
  0xbc   :  { %1767 = vmatpush.bf16.msrb.mxu2 %v3435_v13  ;;  %v3499_v13 = vor.u32 %v4836_v62, %v3496_v63  ;;  %v4123_v20 = vor.u32 %v4992_v10, %v4120_v12  ;;  %v3928_v61 = vld [vmem:[#allocation2 + $0x578] sm:$0xf0]  ;;  %v5343_v62 = vpop.f32.mrf.mxu0  ;;  %v4976_v63 = vld [vmem:[#allocation2 + $0x66c] sm:$0xf] }
  0xbd   :  { %1781 = vmatpush.bf16.msrb.mxu3 %v3563_v17  ;;  %v4892_v17 = vld [vmem:[#allocation2 + $0x3cc] sm:$0xf]  ;;  %v3784_v10 = vld [vmem:[#allocation2 + $0x458] sm:$0xf0] }
  0xbe   :  { %1740 = vmatpush.bf16.msrb.mxu0 %v4055_v24  ;;  %v3976_v24 = vld [vmem:[#allocation2 + $0x5d8] sm:$0xf0]  ;;  %v3723_v27 = vor.u32 %v4892_v17, %v3720_v18  ;;  %v4940_v12 = vld [vmem:[#allocation2 + $0x54c] sm:$0xf] }
  0xbf   :  { %1754 = vmatpush.bf16.msrb.mxu1 %v3291_v25  ;;  %v4988_v25 = vld [vmem:[#allocation2 + $0x6cc] sm:$0xf]  ;;  %v3979_v29 = vor.u32 %v4956_v22, %v3976_v24  ;;  %v5347_v22 = vpop.f32.mrf.mxu2 }
  0xc0   :  { %1768 = vmatpush.bf16.msrb.mxu2 %v3419_v26  ;;  %v4104_v26 = vld [vmem:[#allocation2 + $0x6d8] sm:$0xf0] }
  0xc1   :  { %1782 = vmatpush.bf16.msrb.mxu3 %v3547_v30  ;;  %v4888_v30 = vld [vmem:[#allocation2 + $0x3ac] sm:$0xf]  ;;  %v4107_v33 = vor.u32 %v4988_v25, %v4104_v26  ;;  %v3768_v25 = vld [vmem:[#allocation2 + $0x438] sm:$0xf0] }
  0xc2   :  { %1741 = vmatpush.bf16.msrb.mxu0 %v4039_v36  ;;  %v3960_v36 = vld [vmem:[#allocation2 + $0x5b8] sm:$0xf0]  ;;  %v3707_v40 = vor.u32 %v4888_v30, %v3704_v31  ;;  %v4936_v26 = vld [vmem:[#allocation2 + $0x52c] sm:$0xf]  ;;  %v5352_v30 = vld [vmem:[%s5516_s2] sm:$0xf]  ;;  %v3771_v34 = vor.u32 %v4904_v21, %v3768_v25 }
  0xc3   :  { %1755 = vmatpush.bf16.msrb.mxu1 %v3275_v38  ;;  %v4984_v38 = vld [vmem:[#allocation2 + $0x6ac] sm:$0xf]  ;;  %v3963_v44 = vor.u32 %v4952_v35, %v3960_v36  ;;  %v3624_v36 = vld [vmem:[#allocation2 + $0x318] sm:$0xf0]  ;;  %v5009_v25 = vld [vmem:[#allocation4 + $0x6c] sm:$0xf0] }
  0xc4   :  { %1769 = vmatpush.bf16.msrb.mxu2 %v3403_v39  ;;  %v4088_v39 = vld [vmem:[#allocation2 + $0x6b8] sm:$0xf0] }
  0xc5   :  { %1783 = vmatpush.bf16.msrb.mxu3 %v3531_v45  ;;  %v4884_v45 = vld [vmem:[#allocation2 + $0x38c] sm:$0xf]  ;;  %v4091_v48 = vor.u32 %v4984_v38, %v4088_v39  ;;  %v3752_v39 = vld [vmem:[#allocation2 + $0x418] sm:$0xf0] }
  0xc6   :  { %1742 = vmatpush.bf16.msrb.mxu0 %v4023_v51  ;;  %v4980_v51 = vld [vmem:[#allocation2 + $0x68c] sm:$0xf] }
  0xc7   :  { %1756 = vmatpush.bf16.msrb.mxu1 %v3259_v54  ;;  %v4880_v54 = vld [vmem:[#allocation2 + $0x36c] sm:$0xf]  ;;  %v4075_v58 = vor.u32 %v4980_v51, %v4072_v52  ;;  %v4366_v51 = vld [vmem:[#allocation4 + $0x1e0] sm:$0xf]  ;;  %v5057_v52 = vld [vmem:[#allocation4 + $0x1ec] sm:$0xf0] }
  0xc8   :  { %1770 = vmatpush.bf16.msrb.mxu2 %v3387_v55  ;;  %v3672_v55 = vld [vmem:[#allocation2 + $0x378] sm:$0xf0]  ;;  %v4900_v38 = vld [vmem:[#allocation2 + $0x40c] sm:$0xf] }
  0xc9   :  { %1784 = vmatpush.bf16.msrb.mxu3 %v3515_v60  ;;  %v4944_v60 = vld [vmem:[#allocation2 + $0x56c] sm:$0xf]  ;;  %v3675_v3 = vor.u32 %v4880_v54, %v3672_v55 }
  0xca   :  { %1743 = vmatpush.bf16.msrb.mxu0 %v4007_v4  ;;  %v3803_v4 = vor.u32 %v4912_v56, %v3800_v59  ;;  %v3931_v5 = vor.u32 %v4944_v60, %v3928_v61  ;;  %v4367_v56 = vor.u32 %v5057_v52, %v4366_v51  ;;  %v5021_v59 = vld [vmem:[#allocation4 + $0xcc] sm:$0xf0]  ;;  %v1495_v60 = vpop.f32.mrf.mxu2  ;;  %v4350_v61 = vld [vmem:[#allocation4 + $0x1c0] sm:$0xf]  ;;  %v293_v52 = vperm.slane %v5352_v30, 1 }
  0xcb   :  { %1757 = vmatpush.bf16.msrb.mxu1 %v3243_v8  ;;  %v4908_v8 = vld [vmem:[#allocation2 + $0x44c] sm:$0xf] }
  0xcc   :  { %1771 = vmatpush.bf16.msrb.mxu2 %v3371_v9  ;;  %v4059_v9 = vor.u32 %v4976_v63, %v4056_v1  ;;  %v3787_v17 = vor.u32 %v4908_v8, %v3784_v10  ;;  %v5053_v63 = vld [vmem:[#allocation4 + $0x1cc] sm:$0xf0]  ;;  %v4334_v10 = vld [vmem:[#allocation4 + $0x1a0] sm:$0xf] }
  0xcd   :  { %1785 = vmatpush.bf16.msrb.mxu3 %v3499_v13  ;;  %1744 = vmatmul.bf16.vlgmr.msrb.gmra.mxu0 %v5319_v41  ;;  %v3912_v13 = vld [vmem:[#allocation2 + $0x558] sm:$0xf0]  ;;  %v5017_v8 = vld [vmem:[#allocation4 + $0xac] sm:$0xf0] }
  0xce   :  { %1792 = vmatpush.bf16.msra.mxu0 %v3739_v14  ;;  %1758 = vmatmul.bf16.vlgmr.msrb.gmra.mxu1 %v5272_v57  ;;  %v4972_v14 = vld [vmem:[#allocation2 + $0x64c] sm:$0xf]  ;;  %v3915_v18 = vor.u32 %v4940_v12, %v3912_v13 }
  0xcf   :  { %1806 = vmatpush.bf16.msra.mxu1 %v3867_v15  ;;  %1772 = vmatmul.bf16.vlgmr.msrb.gmra.mxu2 %v5287_v11  ;;  %v3944_v11 = vld [vmem:[#allocation2 + $0x598] sm:$0xf0] }
  0xd0   :  { %1820 = vmatpush.bf16.msra.mxu2 %v3995_v16  ;;  %1786 = vmatmul.bf16.vlgmr.msrb.gmra.mxu3 %v5277_v0  ;;  %v3691_v0 = vor.u32 %v4884_v45, %v3688_v46  ;;  %v3947_v57 = vor.u32 %v4948_v50, %v3944_v11  ;;  %v4040_v15 = vld [vmem:[#allocation2 + $0x658] sm:$0xf0]  ;;  %v3659_v16 = vor.u32 %v4876_v6, %v3656_v7  ;;  %v4964_v46 = vld [vmem:[#allocation2 + $0x60c] sm:$0xf]  ;;  %v5025_v50 = vld [vmem:[#allocation4 + $0xec] sm:$0xf0] }
  0xd1   :  { %1834 = vmatpush.bf16.msra.mxu3 %v4123_v20  ;;  %v3640_v20 = vld [vmem:[#allocation2 + $0x338] sm:$0xf0]  ;;  %v4043_v24 = vor.u32 %v4972_v14, %v4040_v15  ;;  %v3627_v11 = vor.u32 %v4868_v32, %v3624_v36  ;;  %v4239_v55 = vor.u32 %v5025_v50, %v4238_v49  ;;  %v4351_v6 = vor.u32 %v5053_v63, %v4350_v61  ;;  %v4206_v7 = vld [vmem:[#allocation4 + $0xa0] sm:$0xf]  ;;  %v1509_v14 = vpop.f32.mrf.mxu3  ;;  %v5033_v49 = vld [vmem:[#allocation4 + $0x12c] sm:$0xf0] }
  0xd2   :  { %1793 = vmatpush.bf16.msra.mxu0 %v3723_v27  ;;  %v3896_v27 = vld [vmem:[#allocation2 + $0x538] sm:$0xf0]  ;;  %v3643_v31 = vor.u32 %v4872_v19, %v3640_v20  ;;  %v4207_v15 = vor.u32 %v5017_v8, %v4206_v7  ;;  %v5045_v19 = vld [vmem:[#allocation4 + $0x18c] sm:$0xf0]  ;;  %v4286_v36 = vld [vmem:[#allocation4 + $0x140] sm:$0xf] }
  0xd3   :  { %1807 = vmatpush.bf16.msra.mxu1 %v3851_v28  ;;  %v4968_v28 = vld [vmem:[#allocation2 + $0x62c] sm:$0xf]  ;;  %v3899_v35 = vor.u32 %v4936_v26, %v3896_v27  ;;  %v3880_v45 = vld [vmem:[#allocation2 + $0x518] sm:$0xf0]  ;;  %v4302_v26 = vld [vmem:[#allocation4 + $0x160] sm:$0xf] }
  0xd4   :  { %1821 = vmatpush.bf16.msra.mxu2 %v3979_v29  ;;  %v4024_v29 = vld [vmem:[#allocation2 + $0x638] sm:$0xf0]  ;;  %v5089_v61 = vld [vmem:[#allocation4 + $0x2ec] sm:$0xf0]  ;;  %v4368_v7 = vld [vmem:[#allocation4 + $0x1f0] sm:$0xf0] }
  0xd5   :  { %1835 = vmatpush.bf16.msra.mxu3 %v4107_v33  ;;  %v1467_v33 = vpop.f32.mrf.mxu0  ;;  %v5029_v63 = vld [vmem:[#allocation4 + $0x10c] sm:$0xf0] }
  0xd6   :  { %1794 = vmatpush.bf16.msra.mxu0 %v3707_v40  ;;  %v1481_v40 = vpop.f32.mrf.mxu1 }
  0xd7   :  { %1808 = vmatpush.bf16.msra.mxu1 %v3835_v43  ;;  %v4027_v43 = vor.u32 %v4968_v28, %v4024_v29 }
  0xd8   :  { %1822 = vmatpush.bf16.msra.mxu2 %v3963_v44  ;;  %v4932_v44 = vld [vmem:[#allocation2 + $0x50c] sm:$0xf] }
  0xd9   :  { %1836 = vmatpush.bf16.msra.mxu3 %v4091_v48  ;;  %v4008_v48 = vld [vmem:[#allocation2 + $0x618] sm:$0xf0] }
  0xda   :  { %1795 = vmatpush.bf16.msra.mxu0 %v3691_v0  ;;  %v292_v0 = vperm.slane %v5352_v30, 0  ;;  %v4011_v54 = vor.u32 %v4964_v46, %v4008_v48  ;;  %v5001_v46 = vld [vmem:[#allocation4 + $0x2c] sm:$0xf0]  ;;  %v4270_v48 = vld [vmem:[#allocation4 + $0x120] sm:$0xf] }
  0xdb   :  { %1809 = vmatpush.bf16.msra.mxu1 %v3819_v53  ;;  %v3755_v53 = vor.u32 %v4900_v38, %v3752_v39  ;;  %v5037_v38 = vld [vmem:[#allocation4 + $0x14c] sm:$0xf0] }
  0xdc   :  { %1823 = vmatpush.bf16.msra.mxu2 %v3947_v57  ;;  %v3883_v57 = vor.u32 %v4932_v44, %v3880_v45  ;;  %v1466_v1 = vadd.f32 %v5343_v62, %v292_v0  ;;  %v5049_v62 = vld [vmem:[#allocation4 + $0x1ac] sm:$0xf0]  ;;  %v4287_v44 = vor.u32 %v5037_v38, %v4286_v36  ;;  %v4142_v45 = vld [vmem:[#allocation4 + $0x20] sm:$0xf] }
  0xdd   :  { %1837 = vmatpush.bf16.msra.mxu3 %v4075_v58  ;;  %v4222_v58 = vld [vmem:[#allocation4 + $0xc0] sm:$0xf] }
  0xde   :  { %1796 = vmatpush.bf16.msra.mxu0 %v3675_v3  ;;  %v1468_v3 = vadd.f32 %v1467_v33, %v292_v0  ;;  %v1480_v12 = vadd.f32 %v5345_v2, %v1466_v1  ;;  %v5023_v1 = vld [vmem:[#allocation4 + $0xe4] sm:$0xf]  ;;  %v4446_v38 = vld [vmem:[#allocation4 + $0x280] sm:$0xf] }
  0xdf   :  { %1810 = vmatpush.bf16.msra.mxu1 %v3803_v4  ;;  %v4223_v4 = vor.u32 %v5021_v59, %v4222_v58  ;;  %v4271_v58 = vor.u32 %v5033_v49, %v4270_v48  ;;  %v4254_v59 = vld [vmem:[#allocation4 + $0x100] sm:$0xf]  ;;  %v4320_v48 = vld [vmem:[#allocation4 + $0x190] sm:$0xf0] }
  0xe0   :  { %1824 = vmatpush.bf16.msra.mxu2 %v3931_v5  ;;  %v1521_v5 = vpop.f32.mrf.mxu0  ;;  %v1482_v13 = vadd.f32 %v1481_v40, %v1468_v3  ;;  %v4240_v3 = vld [vmem:[#allocation4 + $0xf0] sm:$0xf0] }
  0xe1   :  { %1838 = vmatpush.bf16.msra.mxu3 %v4059_v9  ;;  %v1535_v9 = vpop.f32.mrf.mxu1 }
  0xe2   :  { %1797 = vmatpush.bf16.msra.mxu0 %v3659_v16  ;;  %v4190_v16 = vld [vmem:[#allocation4 + $0x80] sm:$0xf]  ;;  %v1496_v20 = vadd.f32 %v1495_v60, %v1482_v13 }
  0xe3   :  { %1811 = vmatpush.bf16.msra.mxu1 %v3787_v17  ;;  %v5013_v17 = vld [vmem:[#allocation4 + $0x8c] sm:$0xf0]  ;;  %v4494_v60 = vld [vmem:[#allocation4 + $0x2e0] sm:$0xf] }
  0xe4   :  { %1825 = vmatpush.bf16.msra.mxu2 %v3915_v18  ;;  %v4318_v18 = vld [vmem:[#allocation4 + $0x180] sm:$0xf]  ;;  %v4191_v21 = vor.u32 %v5013_v17, %v4190_v16  ;;  %v1510_v28 = vadd.f32 %v1509_v14, %v1496_v20  ;;  %v5085_v16 = vld [vmem:[#allocation4 + $0x2cc] sm:$0xf0] }
  0xe5   :  { %1839 = vmatpush.bf16.msra.mxu3 %v4043_v24  ;;  %v4319_v2 = vor.u32 %v5045_v19, %v4318_v18  ;;  %v4174_v24 = vld [vmem:[#allocation4 + $0x60] sm:$0xf]  ;;  %v5051_v19 = vld [vmem:[#allocation4 + $0x1c4] sm:$0xf] }
  0xe6   :  { %1798 = vmatpush.bf16.msra.mxu0 %v3643_v31  ;;  %v1563_v31 = vpop.f32.mrf.mxu3  ;;  %v4175_v33 = vor.u32 %v5009_v25, %v4174_v24  ;;  %v4478_v13 = vld [vmem:[#allocation4 + $0x2c0] sm:$0xf] }
  0xe7   :  { %1812 = vmatpush.bf16.msra.mxu1 %v3771_v34  ;;  %v4158_v34 = vld [vmem:[#allocation4 + $0x40] sm:$0xf]  ;;  %v1564_v8 = vadd.f32 %v1563_v31, %v293_v52  ;;  %v4479_v20 = vor.u32 %v5085_v16, %v4478_v13  ;;  %v4208_v31 = vld [vmem:[#allocation4 + $0xb0] sm:$0xf0] }
  0xe8   :  { %1826 = vmatpush.bf16.msra.mxu2 %v3899_v35  ;;  %v1523_v29 = vpop.f32.mrf.mxu0  ;;  %v5005_v35 = vld [vmem:[#allocation4 + $0x4c] sm:$0xf0]  ;;  %v4462_v25 = vld [vmem:[#allocation4 + $0x2a0] sm:$0xf] }
  0xe9   :  { %1840 = vmatpush.bf16.msra.mxu3 %v4027_v43  ;;  %v1537_v32 = vpop.f32.mrf.mxu1  ;;  %v1524_v40 = vadd.f32 %v1523_v29, %v1510_v28  ;;  %v4159_v43 = vor.u32 %v5005_v35, %v4158_v34  ;;  %v5015_v29 = vld [vmem:[#allocation4 + $0xa4] sm:$0xf]  ;;  %v4336_v34 = vld [vmem:[#allocation4 + $0x1b0] sm:$0xf0]  ;;  %v4398_v16 = vld [vmem:[#allocation4 + $0x220] sm:$0xf] }
  0xea   :  { %1799 = vmatpush.bf16.msra.mxu0 %v3627_v11  ;;  %v4211_v36 = vor.u32 %v5015_v29, %v4208_v31  ;;  %v5027_v29 = vld [vmem:[#allocation4 + $0x104] sm:$0xf]  ;;  %v4382_v31 = vld [vmem:[#allocation4 + $0x200] sm:$0xf] }
  0xeb   :  { %1813 = vmatpush.bf16.msra.mxu1 %v3755_v53  ;;  %v1538_v11 = vadd.f32 %v1537_v32, %v1524_v40  ;;  %v4143_v53 = vor.u32 %v5001_v46, %v4142_v45  ;;  %v4192_v45 = vld [vmem:[#allocation4 + $0x90] sm:$0xf0] }
  0xec   :  { %1827 = vmatpush.bf16.msra.mxu2 %v3883_v57  ;;  %v4126_v57 = vld [vmem:[#allocation4] sm:$0xf] }
  0xed   :  { %1841 = vmatpush.bf16.msra.mxu3 %v4011_v54  ;;  %1800 = vmatmul.bf16.vlgmr.msra.gmra.mxu0 %v5296_v23  ;;  %v4335_v23 = vor.u32 %v5049_v62, %v4334_v10  ;;  %v4997_v54 = vld [vmem:[#allocation4 + $0xc] sm:$0xf0]  ;;  %v4255_v62 = vor.u32 %v5029_v63, %v4254_v59  ;;  %v5039_v59 = vld [vmem:[#allocation4 + $0x164] sm:$0xf] }
  0xee   :  { %2638 = vmatpush.bf16.msrb.mxu0 %v4239_v55  ;;  %1814 = vmatmul.bf16.vlgmr.msra.gmra.mxu1 %v5317_v37  ;;  %v1494_v37 = vadd.f32 %v5347_v22, %v1480_v12  ;;  %v4243_v12 = vor.u32 %v5023_v1, %v4240_v3 }
  0xef   :  { %2652 = vmatpush.bf16.msrb.mxu1 %v4367_v56  ;;  %1828 = vmatmul.bf16.vlgmr.msra.gmra.mxu2 %v5321_v42  ;;  %v1549_v42 = vpop.f32.mrf.mxu2  ;;  %v1565_v56 = vpop.f32.mrf.mxu3 }
  0xf0   :  { %1842 = vmatmul.bf16.vlgmr.msra.gmra.mxu3 %v5319_v41  ;;  %v5041_v41 = vld [vmem:[#allocation4 + $0x16c] sm:$0xf0]  ;;  %v1508_v27 = vadd.f32 %v5354_v47, %v1494_v37  ;;  %v1577_v51 = vpop.f32.mrf.mxu0  ;;  %v4352_v37 = vld [vmem:[#allocation4 + $0x1d0] sm:$0xf0] }
  0xf1   :  { %v4303_v22 = vor.u32 %v5041_v41, %v4302_v26  ;;  %v1591_v0 = vpop.f32.mrf.mxu1  ;;  %v5081_v26 = vld [vmem:[#allocation4 + $0x2ac] sm:$0xf0]  ;;  %v1566_v41 = vadd.f32 %v1565_v56, %v293_v52  ;;  %v4355_v28 = vor.u32 %v5051_v19, %v4352_v37  ;;  %v4430_v52 = vld [vmem:[#allocation4 + $0x260] sm:$0xf]  ;;  %v4176_v56 = vld [vmem:[#allocation4 + $0x70] sm:$0xf0] }
  0xf2   :  { %2639 = vmatpush.bf16.msrb.mxu0 %v4223_v4  ;;  %v1522_v39 = vadd.f32 %v1521_v5, %v1508_v27  ;;  %v4495_v4 = vor.u32 %v5089_v61, %v4494_v60  ;;  %v4463_v32 = vor.u32 %v5081_v26, %v4462_v25  ;;  %v4304_v60 = vld [vmem:[#allocation4 + $0x170] sm:$0xf0] }
  0xf3   :  { %2653 = vmatpush.bf16.msrb.mxu1 %v4351_v6  ;;  %v5055_v6 = vld [vmem:[#allocation4 + $0x1e4] sm:$0xf]  ;;  %v4272_v25 = vld [vmem:[#allocation4 + $0x130] sm:$0xf0] }
  0xf4   :  { %v1536_v50 = vadd.f32 %v1535_v9, %v1522_v39  ;;  %v4127_v9 = vor.u32 %v4997_v54, %v4126_v57  ;;  %2666 = vmatpush.bf16.msrb.mxu2 %v4495_v4  ;;  %v4371_v14 = vor.u32 %v5055_v6, %v4368_v7  ;;  %v5077_v39 = vld [vmem:[#allocation4 + $0x28c] sm:$0xf0]  ;;  %v5003_v4 = vld [vmem:[#allocation4 + $0x44] sm:$0xf] }
  0xf5   :  { %v4447_v46 = vor.u32 %v5077_v39, %v4446_v38  ;;  %v5069_v6 = vld [vmem:[#allocation4 + $0x24c] sm:$0xf0]  ;;  %v4496_v38 = vld [vmem:[#allocation4 + $0x2f0] sm:$0xf0] }
  0xf6   :  { %2640 = vmatpush.bf16.msrb.mxu0 %v4207_v15  ;;  %v1550_v5 = vadd.f32 %v1549_v42, %v1536_v50  ;;  %v5019_v15 = vld [vmem:[#allocation4 + $0xc4] sm:$0xf]  ;;  %v1578_v42 = vadd.f32 %v1577_v51, %v1564_v8  ;;  %v4307_v8 = vor.u32 %v5039_v59, %v4304_v60  ;;  %v4256_v39 = vld [vmem:[#allocation4 + $0x110] sm:$0xf0]  ;;  %v4622_v59 = vld [vmem:[#allocation4 + $0x3e0] sm:$0xf] }
  0xf7   :  { %2654 = vmatpush.bf16.msrb.mxu1 %v4335_v23  ;;  %v1551_v47 = vpop.f32.mrf.mxu2  ;;  %v4224_v23 = vld [vmem:[#allocation4 + $0xd0] sm:$0xf0]  ;;  %v5121_v60 = vld [vmem:[#allocation4 + $0x3ec] sm:$0xf0] }
  0xf8   :  { %v1552_v55 = vadd.f32 %v1551_v47, %v1538_v11  ;;  %v1848_v17 = vmax.f32 %v1550_v5, 0.0  ;;  %v4227_v24 = vor.u32 %v5019_v15, %v4224_v23  ;;  %2667 = vmatpush.bf16.msrb.mxu2 %v4479_v20  ;;  %v1592_v35 = vadd.f32 %v1591_v0, %v1578_v42  ;;  %v5043_v47 = vld [vmem:[#allocation4 + $0x184] sm:$0xf]  ;;  %v5073_v0 = vld [vmem:[#allocation4 + $0x26c] sm:$0xf0] }
  0xf9   :  { %v1593_v27 = vpop.f32.mrf.mxu1  ;;  %v4323_v57 = vor.u32 %v5043_v47, %v4320_v48  ;;  %v4414_v5 = vld [vmem:[#allocation4 + $0x240] sm:$0xf]  ;;  %v4999_v20 = vld [vmem:[#allocation4 + $0x24] sm:$0xf]  ;;  %v4144_v42 = vld [vmem:[#allocation4 + $0x30] sm:$0xf0] }
  0xfa   :  { %2641 = vmatpush.bf16.msrb.mxu0 %v4191_v21  ;;  %v1852_v10 = vmax.f32 %v1552_v55, 0.0  ;;  %v5007_v55 = vld [vmem:[#allocation4 + $0x64] sm:$0xf]  ;;  %v5058_v47 = vld [vmem:[#allocation4 + $0x1f4] sm:$0xf0] }
  0xfb   :  { %2655 = vmatpush.bf16.msrb.mxu1 %v4319_v2  ;;  %v1579_v2 = vpop.f32.mrf.mxu0  ;;  %v4179_v3 = vor.u32 %v5007_v55, %v4176_v56 }
  0xfc   :  { %v5366_v21 = vpack.c.bf16 %v1852_v10, %v1848_v17  ;;  %v1580_v40 = vadd.f32 %v1579_v2, %v1566_v41  ;;  %2668 = vmatpush.bf16.msrb.mxu2 %v4463_v32  ;;  %v5035_v10 = vld [vmem:[#allocation4 + $0x144] sm:$0xf]  ;;  %v5065_v17 = vld [vmem:[#allocation4 + $0x22c] sm:$0xf0] }
  0xfd   :  { %v4399_v2 = vor.u32 %v5065_v17, %v4398_v16  ;;  %v4995_v41 = vld [vmem:[#allocation4 + $0x4] sm:$0xf]  ;;  %v5061_v32 = vld [vmem:[#allocation4 + $0x20c] sm:$0xf0]  ;;  %v4326_v16 = vld [vmem:[#allocation4 + $0x188] sm:$0xf] }
  0xfe   :  { %2642 = vmatpush.bf16.msrb.mxu0 %v4175_v33  ;;  %v1619_v33 = vpop.f32.mrf.mxu3  ;;  %v5046_v17 = vld [vmem:[#allocation4 + $0x194] sm:$0xf0] }
  0xff   :  { %2656 = vmatpush.bf16.msrb.mxu1 %v4303_v22  ;;  %v1605_v18 = vpop.f32.mrf.mxu2  ;;  %v5047_v22 = vld [vmem:[#allocation4 + $0x1a4] sm:$0xf] }
 0x100   :  { %v1606_v49 = vadd.f32 %v1605_v18, %v1592_v35  ;;  %2669 = vmatpush.bf16.msrb.mxu2 %v4447_v46  ;;  %v4383_v35 = vor.u32 %v5061_v32, %v4382_v31  ;;  %v4374_v46 = vld [vmem:[#allocation4 + $0x1e8] sm:$0xf] }
 0x102   :  { %2643 = vmatpush.bf16.msrb.mxu0 %v4159_v43  ;;  %v4339_v43 = vor.u32 %v5047_v22, %v4336_v34  ;;  %v1620_v61 = vadd.f32 %v1619_v33, %v1606_v49  ;;  %v4259_v49 = vor.u32 %v5027_v29, %v4256_v39  ;;  %v5042_v29 = vld [vmem:[#allocation4 + $0x174] sm:$0xf0] }
 0x103   :  { %2657 = vmatpush.bf16.msrb.mxu1 %v4287_v44  ;;  %v5011_v44 = vld [vmem:[#allocation4 + $0x84] sm:$0xf]  ;;  %v5006_v39 = vld [vmem:[#allocation4 + $0x54] sm:$0xf0] }
 0x104   :  { %v4195_v51 = vor.u32 %v5011_v44, %v4192_v45 }
 0x106   :  { %2644 = vmatpush.bf16.msrb.mxu0 %v4143_v53  ;;  %v1594_v53 = vadd.f32 %v1593_v27, %v1580_v40  ;;  %v1621_v1 = vpop.f32.mrf.mxu3  ;;  %v4128_v27 = vld [vmem:[#allocation4 + $0x10] sm:$0xf0]  ;;  %v4246_v40 = vld [vmem:[#allocation4 + $0xe8] sm:$0xf] }
 0x107   :  { %2658 = vmatpush.bf16.msrb.mxu1 %v4271_v58  ;;  %v1607_v50 = vpop.f32.mrf.mxu2  ;;  %v4431_v58 = vor.u32 %v5073_v0, %v4430_v52  ;;  %v4131_v48 = vor.u32 %v4995_v41, %v4128_v27  ;;  %v4230_v52 = vld [vmem:[#allocation4 + $0xc8] sm:$0xf]  ;;  %v5022_v0 = vld [vmem:[#allocation4 + $0xd4] sm:$0xf0]  ;;  %v5071_v41 = vld [vmem:[#allocation4 + $0x264] sm:$0xf] }
 0x108   :  { %v1608_v63 = vadd.f32 %v1607_v50, %v1594_v53  ;;  %v4480_v53 = vld [vmem:[#allocation4 + $0x2d0] sm:$0xf0]  ;;  %v4231_v56 = vor.u32 %v5022_v0, %v4230_v52  ;;  %v5002_v52 = vld [vmem:[#allocation4 + $0x34] sm:$0xf0] }
 0x109   :  { %2670 = vmatpush.bf16.msrb.mxu2 %v4431_v58  ;;  %v4214_v58 = vld [vmem:[#allocation4 + $0xa8] sm:$0xf]  ;;  %v4432_v27 = vld [vmem:[#allocation4 + $0x270] sm:$0xf0] }
 0x10a   :  { %2645 = vmatpush.bf16.msrb.mxu0 %v4127_v9  ;;  %v1633_v11 = vpop.f32.mrf.mxu0  ;;  %v4160_v9 = vld [vmem:[#allocation4 + $0x50] sm:$0xf0]  ;;  %v1622_v13 = vadd.f32 %v1621_v1, %v1608_v63  ;;  %v5018_v63 = vld [vmem:[#allocation4 + $0xb4] sm:$0xf0]  ;;  %v4623_v1 = vor.u32 %v5121_v60, %v4622_v59  ;;  %v4435_v31 = vor.u32 %v5071_v41, %v4432_v27  ;;  %v4134_v60 = vld [vmem:[#allocation4 + $0x8] sm:$0xf] }
 0x10b   :  { %2659 = vmatpush.bf16.msrb.mxu1 %v4255_v62  ;;  %v1647_v54 = vpop.f32.mrf.mxu1  ;;  %v1634_v7 = vadd.f32 %v1633_v11, %v1620_v61  ;;  %v4288_v62 = vld [vmem:[#allocation4 + $0x150] sm:$0xf0]  ;;  %v4163_v15 = vor.u32 %v5003_v4, %v4160_v9  ;;  %v5083_v11 = vld [vmem:[#allocation4 + $0x2c4] sm:$0xf]  ;;  %v4606_v9 = vld [vmem:[#allocation4 + $0x3c0] sm:$0xf] }
 0x10c   :  { %v4291_v23 = vor.u32 %v5035_v10, %v4288_v62  ;;  %v4483_v55 = vor.u32 %v5083_v11, %v4480_v53  ;;  %v4464_v4 = vld [vmem:[#allocation4 + $0x2b0] sm:$0xf0]  ;;  %2680 = vmatpush.bf16.msrb.mxu3 %v4623_v1  ;;  %v5117_v10 = vld [vmem:[#allocation4 + $0x3cc] sm:$0xf0]  ;;  %v5075_v62 = vld [vmem:[#allocation4 + $0x284] sm:$0xf] }
 0x10d   :  { %2646 = vmatmul.bf16.vlgmr.msrb.gmra.mxu0 %v5366_v21  ;;  %v1648_v18 = vadd.f32 %v1647_v54, %v1634_v7  ;;  %v5054_v54 = vld [vmem:[#allocation4 + $0x1d4] sm:$0xf0]  ;;  %v5105_v11 = vld [vmem:[#allocation4 + $0x36c] sm:$0xf0]  ;;  %v5063_v53 = vld [vmem:[#allocation4 + $0x224] sm:$0xf] }
 0x10e   :  { %2694 = vmatpush.bf16.msra.mxu0 %v4243_v12  ;;  %v4415_v12 = vor.u32 %v5069_v6, %v4414_v5  ;;  %v4342_v5 = vld [vmem:[#allocation4 + $0x1a8] sm:$0xf]  ;;  %v5050_v6 = vld [vmem:[#allocation4 + $0x1b4] sm:$0xf0]  ;;  %v5052_v41 = vld [vmem:[#allocation4 + $0x1cc] sm:$0xf] }
 0x10f   :  { %2708 = vmatpush.bf16.msra.mxu1 %v4371_v14  ;;  %v1849_v33 = vmax.f32 %v1648_v18, 0.0  ;;  %v4262_v1 = vld [vmem:[#allocation4 + $0x108] sm:$0xf]  ;;  %v4360_v27 = vld [vmem:[#allocation4 + $0x1d8] sm:$0xf0] }
 0x110   :  { %2671 = vmatpush.bf16.msrb.mxu2 %v4415_v12  ;;  %v4343_v12 = vor.u32 %v5050_v6, %v4342_v5  ;;  %v5101_v6 = vld [vmem:[#allocation4 + $0x34c] sm:$0xf0] }
 0x112   :  { %2695 = vmatpush.bf16.msra.mxu0 %v4227_v24  ;;  %v1635_v14 = vpop.f32.mrf.mxu0  ;;  %v5031_v24 = vld [vmem:[#allocation4 + $0x124] sm:$0xf] }
 0x113   :  { %2709 = vmatpush.bf16.msra.mxu1 %v4355_v28  ;;  %v1636_v19 = vadd.f32 %v1635_v14, %v1622_v13  ;;  %v1649_v37 = vpop.f32.mrf.mxu1  ;;  %v4147_v28 = vor.u32 %v4999_v20, %v4144_v42  ;;  %v4275_v34 = vor.u32 %v5031_v24, %v4272_v25  ;;  %v4198_v13 = vld [vmem:[#allocation4 + $0x88] sm:$0xf]  ;;  %v5014_v14 = vld [vmem:[#allocation4 + $0x94] sm:$0xf0]  ;;  %v4590_v20 = vld [vmem:[#allocation4 + $0x3a0] sm:$0xf]  ;;  %v4327_v24 = vor.u32 %v5046_v17, %v4326_v16 }
 0x114   :  { %2672 = vmatpush.bf16.msrb.mxu2 %v4399_v2  ;;  %v5113_v42 = vld [vmem:[#allocation4 + $0x3ac] sm:$0xf0]  ;;  %v5373_v2 = vpop.f32.mrf.mxu2  ;;  %v5010_v25 = vld [vmem:[#allocation4 + $0x74] sm:$0xf0]  ;;  %v4526_v17 = vld [vmem:[#allocation4 + $0x320] sm:$0xf] }
 0x115   :  { %v1650_v26 = vadd.f32 %v1649_v37, %v1636_v19  ;;  %v4199_v19 = vor.u32 %v5014_v14, %v4198_v13  ;;  %v4182_v37 = vld [vmem:[#allocation4 + $0x68] sm:$0xf]  ;;  %v5056_v14 = vld [vmem:[#allocation4 + $0x1ec] sm:$0xf] }
 0x116   :  { %2696 = vmatpush.bf16.msra.mxu0 %v4211_v36  ;;  %v5087_v36 = vld [vmem:[#allocation4 + $0x2e4] sm:$0xf]  ;;  %v4183_v32 = vor.u32 %v5010_v25, %v4182_v37  ;;  %v4232_v25 = vld [vmem:[#allocation4 + $0xd8] sm:$0xf0] }
 0x117   :  { %2710 = vmatpush.bf16.msra.mxu1 %v4339_v43  ;;  %v1853_v22 = vmax.f32 %v1650_v26, 0.0  ;;  %v5026_v43 = vld [vmem:[#allocation4 + $0xf4] sm:$0xf0]  ;;  %v4499_v44 = vor.u32 %v5087_v36, %v4496_v38  ;;  %v4591_v26 = vor.u32 %v5113_v42, %v4590_v20  ;;  %v4166_v38 = vld [vmem:[#allocation4 + $0x48] sm:$0xf] }
 0x118   :  { %v4247_v50 = vor.u32 %v5026_v43, %v4246_v40  ;;  %2673 = vmatpush.bf16.msrb.mxu2 %v4383_v35  ;;  %v5375_v35 = vpop.f32.mrf.mxu3  ;;  %v4416_v43 = vld [vmem:[#allocation4 + $0x250] sm:$0xf0] }
 0x119   :  { %v5369_v45 = vpack.c.bf16 %v1853_v22, %v1849_v33  ;;  %v4574_v33 = vld [vmem:[#allocation4 + $0x380] sm:$0xf]  ;;  %v5109_v22 = vld [vmem:[#allocation4 + $0x38c] sm:$0xf0] }
 0x11a   :  { %2697 = vmatpush.bf16.msra.mxu0 %v4195_v51  ;;  %v4375_v51 = vor.u32 %v5058_v47, %v4374_v46  ;;  %v4575_v40 = vor.u32 %v5109_v22, %v4574_v33  ;;  %v5038_v46 = vld [vmem:[#allocation4 + $0x154] sm:$0xf0] }
 0x11b   :  { %2711 = vmatpush.bf16.msra.mxu1 %v4323_v57  ;;  %v4358_v57 = vld [vmem:[#allocation4 + $0x1c8] sm:$0xf] }
 0x11c   :  { %2660 = vmatmul.bf16.vlgmr.msrb.gmra.mxu1 %v5369_v45  ;;  %2722 = vmatpush.bf16.msra.mxu2 %v4499_v44  ;;  %v4359_v61 = vor.u32 %v5054_v54, %v4358_v57  ;;  %v4294_v44 = vld [vmem:[#allocation4 + $0x148] sm:$0xf]  ;;  %v4400_v57 = vld [vmem:[#allocation4 + $0x230] sm:$0xf0]  ;;  %v1663_v59 = vpop.f32.mrf.mxu2 }
 0x11d   :  { %v4278_v54 = vld [vmem:[#allocation4 + $0x128] sm:$0xf] }
 0x11e   :  { %2698 = vmatpush.bf16.msra.mxu0 %v4179_v3  ;;  %v5079_v3 = vld [vmem:[#allocation4 + $0x2a4] sm:$0xf] }
 0x11f   :  { %2712 = vmatpush.bf16.msra.mxu1 %v4307_v8  ;;  %v4467_v7 = vor.u32 %v5079_v3, %v4464_v4  ;;  %v4215_v8 = vor.u32 %v5018_v63, %v4214_v58  ;;  %v294_v58 = vperm.slane %v5352_v30, 2  ;;  %v4998_v63 = vld [vmem:[#allocation4 + $0x14] sm:$0xf0]  ;;  %v4542_v3 = vld [vmem:[#allocation4 + $0x340] sm:$0xf] }
 0x120   :  { %2723 = vmatpush.bf16.msra.mxu2 %v4483_v55  ;;  %v5034_v55 = vld [vmem:[#allocation4 + $0x134] sm:$0xf0]  ;;  %v1677_v13 = vpop.f32.mrf.mxu3  ;;  %v4135_v16 = vor.u32 %v4998_v63, %v4134_v60  ;;  %v4592_v63 = vld [vmem:[#allocation4 + $0x3b0] sm:$0xf0] }
 0x121   :  { %v4279_v5 = vor.u32 %v5034_v55, %v4278_v54  ;;  %v5044_v54 = vld [vmem:[#allocation4 + $0x18c] sm:$0xf]  ;;  %v4328_v55 = vld [vmem:[#allocation4 + $0x198] sm:$0xf0] }
 0x122   :  { %2699 = vmatpush.bf16.msra.mxu0 %v4163_v15  ;;  %v4607_v15 = vor.u32 %v5117_v10, %v4606_v9  ;;  %v5030_v9 = vld [vmem:[#allocation4 + $0x114] sm:$0xf0]  ;;  %v5024_v10 = vld [vmem:[#allocation4 + $0xec] sm:$0xf] }
 0x123   :  { %2713 = vmatpush.bf16.msra.mxu1 %v4291_v23  ;;  %v4448_v23 = vld [vmem:[#allocation4 + $0x290] sm:$0xf0] }
 0x124   :  { %2724 = vmatpush.bf16.msra.mxu2 %v4467_v7  ;;  %v4451_v18 = vor.u32 %v5075_v62, %v4448_v23  ;;  %2681 = vmatpush.bf16.msrb.mxu3 %v4607_v15  ;;  %v5059_v7 = vld [vmem:[#allocation4 + $0x204] sm:$0xf]  ;;  %v4248_v62 = vld [vmem:[#allocation4 + $0xf8] sm:$0xf0]  ;;  %v1662_v23 = vadd.f32 %v5373_v2, %v294_v58  ;;  %v4510_v2 = vld [vmem:[#allocation4 + $0x300] sm:$0xf] }
 0x125   :  { %v4376_v15 = vld [vmem:[#allocation4 + $0x1f8] sm:$0xf0]  ;;  %v4251_v37 = vor.u32 %v5024_v10, %v4248_v62 }
 0x126   :  { %2700 = vmatpush.bf16.msra.mxu0 %v4147_v28  ;;  %v4310_v28 = vld [vmem:[#allocation4 + $0x168] sm:$0xf]  ;;  %v4379_v42 = vor.u32 %v5056_v14, %v4376_v15 }
 0x127   :  { %2714 = vmatpush.bf16.msra.mxu1 %v4275_v34  ;;  %v5067_v34 = vld [vmem:[#allocation4 + $0x244] sm:$0xf]  ;;  %v4311_v36 = vor.u32 %v5042_v29, %v4310_v28  ;;  %v1676_v28 = vadd.f32 %v5375_v35, %v1662_v23  ;;  %v1664_v29 = vadd.f32 %v1663_v59, %v294_v58  ;;  %v4344_v35 = vld [vmem:[#allocation4 + $0x1b8] sm:$0xf0]  ;;  %v5004_v23 = vld [vmem:[#allocation4 + $0x4c] sm:$0xf] }
 0x128   :  { %2725 = vmatpush.bf16.msra.mxu2 %v4451_v18  ;;  %2682 = vmatpush.bf16.msrb.mxu3 %v4591_v26  ;;  %v4419_v47 = vor.u32 %v5067_v34, %v4416_v43  ;;  %v5097_v18 = vld [vmem:[#allocation4 + $0x32c] sm:$0xf0]  ;;  %v5119_v34 = vld [vmem:[#allocation4 + $0x3e4] sm:$0xf]  ;;  %v5048_v43 = vld [vmem:[#allocation4 + $0x1ac] sm:$0xf] }
 0x129   :  { %v4527_v20 = vor.u32 %v5097_v18, %v4526_v17 }
 0x12a   :  { %2701 = vmatpush.bf16.msra.mxu0 %v4131_v48  ;;  %v4167_v48 = vor.u32 %v5006_v39, %v4166_v38  ;;  %v1689_v4 = vpop.f32.mrf.mxu0  ;;  %v4363_v38 = vor.u32 %v5052_v41, %v4360_v27  ;;  %v5016_v39 = vld [vmem:[#allocation4 + $0xac] sm:$0xf] }
 0x12b   :  { %2715 = vmatpush.bf16.msra.mxu1 %v4259_v49  ;;  %v4150_v49 = vld [vmem:[#allocation4 + $0x28] sm:$0xf]  ;;  %v1703_v26 = vpop.f32.mrf.mxu1 }
 0x12c   :  { %2726 = vmatpush.bf16.msra.mxu2 %v4435_v31  ;;  %2683 = vmatpush.bf16.msrb.mxu3 %v4575_v40  ;;  %v5093_v31 = vld [vmem:[#allocation4 + $0x30c] sm:$0xf0]  ;;  %v4216_v40 = vld [vmem:[#allocation4 + $0xb8] sm:$0xf0] }
 0x12d   :  { %2702 = vmatmul.bf16.vlgmr.msra.gmra.mxu0 %v5366_v21  ;;  %v4511_v22 = vor.u32 %v5093_v31, %v4510_v2 }
 0x12e   :  { %2750 = vmatpush.bf16.msrb.mxu0 %v4247_v50  ;;  %2716 = vmatmul.bf16.vlgmr.msra.gmra.mxu1 %v5369_v45  ;;  %v4558_v50 = vld [vmem:[#allocation4 + $0x360] sm:$0xf] }
 0x12f   :  { %2764 = vmatpush.bf16.msrb.mxu1 %v4375_v51  ;;  %v4295_v51 = vor.u32 %v5038_v46, %v4294_v44  ;;  %v4559_v0 = vor.u32 %v5105_v11, %v4558_v50  ;;  %v1690_v50 = vadd.f32 %v1689_v4, %v1676_v28  ;;  %v4184_v4 = vld [vmem:[#allocation4 + $0x78] sm:$0xf0]  ;;  %v5000_v28 = vld [vmem:[#allocation4 + $0x2c] sm:$0xf] }
 0x130   :  { %2727 = vmatpush.bf16.msra.mxu2 %v4419_v47  ;;  %v5115_v47 = vld [vmem:[#allocation4 + $0x3c4] sm:$0xf] }
 0x131   :  { %2684 = vmatpush.bf16.msrb.mxu3 %v4559_v0  ;;  %v4347_v0 = vor.u32 %v5048_v43, %v4344_v35  ;;  %v4996_v35 = vld [vmem:[#allocation4 + $0xc] sm:$0xf] }
 0x132   :  { %2751 = vmatpush.bf16.msrb.mxu0 %v4231_v56  ;;  %v4403_v56 = vor.u32 %v5063_v53, %v4400_v57  ;;  %v1691_v46 = vpop.f32.mrf.mxu0  ;;  %v5012_v53 = vld [vmem:[#allocation4 + $0x8c] sm:$0xf]  ;;  %v4200_v57 = vld [vmem:[#allocation4 + $0x98] sm:$0xf0] }
 0x133   :  { %2765 = vmatpush.bf16.msrb.mxu1 %v4359_v61  ;;  %v4151_v61 = vor.u32 %v5002_v52, %v4150_v49  ;;  %v1678_v49 = vadd.f32 %v1677_v13, %v1664_v29  ;;  %v1731_v11 = vpop.f32.mrf.mxu3  ;;  %v1705_v59 = vpop.f32.mrf.mxu1  ;;  %v4203_v60 = vor.u32 %v5012_v53, %v4200_v57  ;;  %v4576_v13 = vld [vmem:[#allocation4 + $0x390] sm:$0xf0]  ;;  %v4152_v29 = vld [vmem:[#allocation4 + $0x38] sm:$0xf0] }
 0x134   :  { %2728 = vmatpush.bf16.msra.mxu2 %v4403_v56  ;;  %v1704_v56 = vadd.f32 %v1703_v26, %v1690_v50  ;;  %v5028_v50 = vld [vmem:[#allocation4 + $0x10c] sm:$0xf] }
 0x135   :  { %v1692_v58 = vadd.f32 %v1691_v46, %v1678_v49 }
 0x136   :  { %2752 = vmatpush.bf16.msrb.mxu0 %v4215_v8  ;;  %v4384_v8 = vld [vmem:[#allocation4 + $0x210] sm:$0xf0] }
 0x137   :  { %2766 = vmatpush.bf16.msrb.mxu1 %v4343_v12  ;;  %v4543_v12 = vor.u32 %v5101_v6, %v4542_v3  ;;  %v4387_v30 = vor.u32 %v5059_v7, %v4384_v8  ;;  %v5008_v3 = vld [vmem:[#allocation4 + $0x6c] sm:$0xf]  ;;  %v1706_v62 = vadd.f32 %v1705_v59, %v1692_v58 }
 0x138   :  { %v5040_v8 = vld [vmem:[#allocation4 + $0x16c] sm:$0xf] }
 0x139   :  { %2685 = vmatpush.bf16.msrb.mxu3 %v4543_v12  ;;  %2729 = vmatpush.bf16.msra.mxu2 %v4387_v30  ;;  %v4187_v12 = vor.u32 %v5008_v3, %v4184_v4  ;;  %v5107_v30 = vld [vmem:[#allocation4 + $0x384] sm:$0xf]  ;;  %v4512_v3 = vld [vmem:[#allocation4 + $0x310] sm:$0xf0] }
 0x13a   :  { %2753 = vmatpush.bf16.msrb.mxu0 %v4199_v19  ;;  %v4263_v19 = vor.u32 %v5030_v9, %v4262_v1  ;;  %v4331_v1 = vor.u32 %v5044_v54, %v4328_v55  ;;  %v4312_v9 = vld [vmem:[#allocation4 + $0x178] sm:$0xf0]  ;;  %v4579_v17 = vor.u32 %v5107_v30, %v4576_v13  ;;  %v5095_v54 = vld [vmem:[#allocation4 + $0x324] sm:$0xf]  ;;  %v4528_v55 = vld [vmem:[#allocation4 + $0x330] sm:$0xf0] }
 0x13b   :  { %2767 = vmatpush.bf16.msrb.mxu1 %v4327_v24  ;;  %v5020_v24 = vld [vmem:[#allocation4 + $0xcc] sm:$0xf]  ;;  %v4315_v15 = vor.u32 %v5040_v8, %v4312_v9  ;;  %v1733_v18 = vpop.f32.mrf.mxu3  ;;  %v4531_v58 = vor.u32 %v5095_v54, %v4528_v55  ;;  %v4454_v9 = vld [vmem:[#allocation4 + $0x288] sm:$0xf]  ;;  %v5122_v55 = vld [vmem:[#allocation4 + $0x3f4] sm:$0xf0] }
 0x13c   :  { %v4235_v33 = vor.u32 %v5020_v24, %v4232_v25  ;;  %v5103_v24 = vld [vmem:[#allocation4 + $0x364] sm:$0xf]  ;;  %v4560_v25 = vld [vmem:[#allocation4 + $0x370] sm:$0xf0]  ;;  %v4438_v13 = vld [vmem:[#allocation4 + $0x268] sm:$0xf] }
 0x13d   :  { %2686 = vmatpush.bf16.msrb.mxu3 %v4527_v20  ;;  %v4563_v2 = vor.u32 %v5103_v24, %v4560_v25  ;;  %v4406_v25 = vld [vmem:[#allocation4 + $0x228] sm:$0xf] }
 0x13e   :  { %2754 = vmatpush.bf16.msrb.mxu0 %v4183_v32  ;;  %v1717_v32 = vpop.f32.mrf.mxu2  ;;  %v4630_v54 = vld [vmem:[#allocation4 + $0x3e8] sm:$0xf] }
 0x13f   :  { %2768 = vmatpush.bf16.msrb.mxu1 %v4311_v36  ;;  %v4624_v36 = vld [vmem:[#allocation4 + $0x3f0] sm:$0xf0]  ;;  %v1718_v10 = vadd.f32 %v1717_v32, %v1704_v56  ;;  %v5032_v32 = vld [vmem:[#allocation4 + $0x12c] sm:$0xf] }
 0x140   :  { %v4627_v44 = vor.u32 %v5119_v34, %v4624_v36  ;;  %v4502_v34 = vld [vmem:[#allocation4 + $0x2e8] sm:$0xf]  ;;  %v5090_v36 = vld [vmem:[#allocation4 + $0x2f4] sm:$0xf0] }
 0x141   :  { %2687 = vmatpush.bf16.msrb.mxu3 %v4511_v22  ;;  %v1732_v20 = vadd.f32 %v1731_v11, %v1718_v10  ;;  %v4503_v49 = vor.u32 %v5090_v36, %v4502_v34  ;;  %v4264_v11 = vld [vmem:[#allocation4 + $0x118] sm:$0xf0]  ;;  %v5078_v10 = vld [vmem:[#allocation4 + $0x294] sm:$0xf0] }
 0x142   :  { %2755 = vmatpush.bf16.msrb.mxu0 %v4167_v48  ;;  %v4608_v48 = vld [vmem:[#allocation4 + $0x3d0] sm:$0xf0]  ;;  %v4267_v56 = vor.u32 %v5028_v50, %v4264_v11  ;;  %v4504_v34 = vld [vmem:[#allocation4 + $0x2f8] sm:$0xf0] }
 0x143   :  { %2769 = vmatpush.bf16.msrb.mxu1 %v4295_v51  ;;  %v4219_v51 = vor.u32 %v5016_v39, %v4216_v40  ;;  %v4611_v52 = vor.u32 %v5115_v47, %v4608_v48  ;;  %v5099_v39 = vld [vmem:[#allocation4 + $0x344] sm:$0xf]  ;;  %v4544_v40 = vld [vmem:[#allocation4 + $0x350] sm:$0xf0]  ;;  %v4136_v47 = vld [vmem:[#allocation4 + $0x18] sm:$0xf0] }
 0x144   :  { %v4547_v48 = vor.u32 %v5099_v39, %v4544_v40  ;;  %v4139_v57 = vor.u32 %v4996_v35, %v4136_v47  ;;  %v4488_v35 = vld [vmem:[#allocation4 + $0x2d8] sm:$0xf0] }
 0x145   :  { %2736 = vmatpush.bf16.msra.mxu3 %v4627_v44 }
 0x146   :  { %2756 = vmatpush.bf16.msrb.mxu0 %v4151_v61  ;;  %v5111_v61 = vld [vmem:[#allocation4 + $0x3a4] sm:$0xf]  ;;  %v1719_v6 = vpop.f32.mrf.mxu2 }
 0x147   :  { %2770 = vmatpush.bf16.msrb.mxu1 %v4279_v5  ;;  %v4595_v5 = vor.u32 %v5111_v61, %v4592_v63  ;;  %v1720_v14 = vadd.f32 %v1719_v6, %v1706_v62  ;;  %v5082_v61 = vld [vmem:[#allocation4 + $0x2b4] sm:$0xf0] }
 0x149   :  { %2737 = vmatpush.bf16.msra.mxu3 %v4611_v52  ;;  %v1734_v26 = vadd.f32 %v1733_v18, %v1720_v14  ;;  %v4486_v52 = vld [vmem:[#allocation4 + $0x2c8] sm:$0xf]  ;;  %v5074_v14 = vld [vmem:[#allocation4 + $0x274] sm:$0xf0] }
 0x14a   :  { %2757 = vmatpush.bf16.msrb.mxu0 %v4135_v16  ;;  %v1745_v7 = vpop.f32.mrf.mxu0  ;;  %v4168_v16 = vld [vmem:[#allocation4 + $0x58] sm:$0xf0] }
 0x14b   :  { %2771 = vmatpush.bf16.msrb.mxu1 %v4263_v19  ;;  %v5036_v19 = vld [vmem:[#allocation4 + $0x14c] sm:$0xf]  ;;  %v1746_v41 = vadd.f32 %v1745_v7, %v1732_v20  ;;  %v1759_v53 = vpop.f32.mrf.mxu1  ;;  %v5160_v7 = vld [vmem:[%s5516_s2] sm:$0xf] }
 0x14c   :  { %v295_v8 = vperm.slane %v5160_v7, 3  ;;  %v5072_v7 = vld [vmem:[#allocation4 + $0x26c] sm:$0xf] }
 0x14d   :  { %2758 = vmatmul.bf16.vlgmr.msrb.gmra.mxu0 %v5366_v21  ;;  %2738 = vmatpush.bf16.msra.mxu3 %v4595_v5  ;;  %v1850_v43 = vmax.f32 %v1746_v41, 0.0 }
 0x14e   :  { %2806 = vmatpush.bf16.msra.mxu0 %v4251_v37  ;;  %2772 = vmatmul.bf16.vlgmr.msrb.gmra.mxu1 %v5369_v45  ;;  %v4296_v37 = vld [vmem:[#allocation4 + $0x158] sm:$0xf0]  ;;  %v1760_v30 = vadd.f32 %v1759_v53, %v295_v8 }
 0x14f   :  { %2820 = vmatpush.bf16.msra.mxu1 %v4379_v42  ;;  %v4171_v42 = vor.u32 %v5004_v23, %v4168_v16  ;;  %v4299_v27 = vor.u32 %v5036_v19, %v4296_v37  ;;  %v4439_v23 = vor.u32 %v5074_v14, %v4438_v13  ;;  %v4422_v37 = vld [vmem:[#allocation4 + $0x248] sm:$0xf]  ;;  %v4472_v53 = vld [vmem:[#allocation4 + $0x2b8] sm:$0xf0] }
 0x150   :  { %v4424_v13 = vld [vmem:[#allocation4 + $0x258] sm:$0xf0]  ;;  %v4582_v14 = vld [vmem:[#allocation4 + $0x388] sm:$0xf] }
 0x151   :  { %2739 = vmatpush.bf16.msra.mxu3 %v4579_v17 }
 0x152   :  { %2807 = vmatpush.bf16.msra.mxu0 %v4235_v33  ;;  %v1747_v31 = vpop.f32.mrf.mxu0  ;;  %v4280_v33 = vld [vmem:[#allocation4 + $0x138] sm:$0xf0]  ;;  %v1773_v63 = vpop.f32.mrf.mxu2 }
 0x153   :  { %2821 = vmatpush.bf16.msra.mxu1 %v4363_v38  ;;  %v1748_v22 = vadd.f32 %v1747_v31, %v1734_v26  ;;  %v4155_v38 = vor.u32 %v5000_v28, %v4152_v29  ;;  %v4283_v46 = vor.u32 %v5032_v32, %v4280_v33  ;;  %v1787_v4 = vpop.f32.mrf.mxu3  ;;  %v1761_v62 = vpop.f32.mrf.mxu1  ;;  %v1774_v16 = vadd.f32 %v1773_v63, %v1760_v30  ;;  %v5066_v26 = vld [vmem:[#allocation4 + $0x234] sm:$0xf0]  ;;  %v4390_v32 = vld [vmem:[#allocation4 + $0x208] sm:$0xf]  ;;  %v4456_v63 = vld [vmem:[#allocation4 + $0x298] sm:$0xf0] }
 0x154   :  { %v1762_v17 = vadd.f32 %v1761_v62, %v295_v8  ;;  %v4407_v28 = vor.u32 %v5066_v26, %v4406_v25  ;;  %v5062_v33 = vld [vmem:[#allocation4 + $0x214] sm:$0xf0]  ;;  %v4440_v8 = vld [vmem:[#allocation4 + $0x278] sm:$0xf0]  ;;  %v5068_v30 = vld [vmem:[#allocation4 + $0x24c] sm:$0xf] }
 0x155   :  { %2740 = vmatpush.bf16.msra.mxu3 %v4563_v2  ;;  %v1854_v44 = vmax.f32 %v1748_v22, 0.0  ;;  %v5088_v22 = vld [vmem:[#allocation4 + $0x2ec] sm:$0xf]  ;;  %v4391_v39 = vor.u32 %v5062_v33, %v4390_v32  ;;  %v4443_v62 = vor.u32 %v5072_v7, %v4440_v8  ;;  %v5102_v25 = vld [vmem:[#allocation4 + $0x354] sm:$0xf0]  ;;  %v5123_v7 = vld [vmem:[%s5519_s5] sm:$0xff] }
 0x156   :  { %2808 = vmatpush.bf16.msra.mxu0 %v4219_v51  ;;  %v5120_v32 = vld [vmem:[#allocation4 + $0x3ec] sm:$0xf]  ;;  %v4632_v33 = vld [vmem:[#allocation4 + $0x3f8] sm:$0xf0]  ;;  %v5135_v8 = vld [vmem:[%s5519_s5 + $0x60] sm:$0xff] }
 0x157   :  { %2822 = vmatpush.bf16.msra.mxu1 %v4347_v0  ;;  %v5383_v51 = vpack.c.bf16 %v1854_v44, %v1850_v43  ;;  %v5086_v0 = vld [vmem:[#allocation4 + $0x2d4] sm:$0xf0]  ;;  %v4507_v43 = vor.u32 %v5088_v22, %v4504_v34  ;;  %v4635_v34 = vor.u32 %v5120_v32, %v4632_v33 }
 0x158   :  { %v4487_v59 = vor.u32 %v5086_v0, %v4486_v52  ;;  %v5080_v0 = vld [vmem:[#allocation4 + $0x2ac] sm:$0xf] }
 0x159   :  { %2741 = vmatpush.bf16.msra.mxu3 %v4547_v48  ;;  %2674 = vmatmul.bf16.vlgmr.msrb.gmra.mxu2 %v5383_v51 }
 0x15a   :  { %2809 = vmatpush.bf16.msra.mxu0 %v4203_v60  ;;  %2778 = vmatpush.bf16.msrb.mxu2 %v4503_v49  ;;  %v4470_v60 = vld [vmem:[#allocation4 + $0x2a8] sm:$0xf] }
 0x15b   :  { %2823 = vmatpush.bf16.msra.mxu1 %v4331_v1  ;;  %v5091_v1 = vld [vmem:[#allocation4 + $0x304] sm:$0xf]  ;;  %v4471_v6 = vor.u32 %v5082_v61, %v4470_v60  ;;  %v1789_v18 = vpop.f32.mrf.mxu3  ;;  %v4631_v60 = vor.u32 %v5122_v55, %v4630_v54  ;;  %v5076_v61 = vld [vmem:[#allocation4 + $0x28c] sm:$0xf]  ;;  %v4520_v55 = vld [vmem:[#allocation4 + $0x318] sm:$0xf0] }
 0x15c   :  { %v4515_v5 = vor.u32 %v5091_v1, %v4512_v3  ;;  %v4614_v3 = vld [vmem:[#allocation4 + $0x3c8] sm:$0xf]  ;;  %v5092_v54 = vld [vmem:[#allocation4 + $0x30c] sm:$0xf] }
 0x15d   :  { %2742 = vmatpush.bf16.msra.mxu3 %v4531_v58 }
 0x15e   :  { %2810 = vmatpush.bf16.msra.mxu0 %v4187_v12  ;;  %2779 = vmatpush.bf16.msrb.mxu2 %v4487_v59  ;;  %v4455_v12 = vor.u32 %v5078_v10, %v4454_v9  ;;  %v4475_v59 = vor.u32 %v5080_v0, %v4472_v53  ;;  %v4598_v9 = vld [vmem:[#allocation4 + $0x3a8] sm:$0xf]  ;;  %v5114_v10 = vld [vmem:[#allocation4 + $0x3b4] sm:$0xf0]  ;;  %v5096_v0 = vld [vmem:[#allocation4 + $0x32c] sm:$0xf] }
 0x15f   :  { %2824 = vmatpush.bf16.msra.mxu1 %v4315_v15  ;;  %v1775_v15 = vpop.f32.mrf.mxu2  ;;  %v4536_v53 = vld [vmem:[#allocation4 + $0x338] sm:$0xf0] }
 0x160   :  { %v1776_v24 = vadd.f32 %v1775_v15, %v1762_v17  ;;  %v5110_v15 = vld [vmem:[#allocation4 + $0x394] sm:$0xf0]  ;;  %v5064_v17 = vld [vmem:[#allocation4 + $0x22c] sm:$0xf] }
 0x161   :  { %2743 = vmatpush.bf16.msra.mxu3 %v4515_v5  ;;  %v4459_v5 = vor.u32 %v5076_v61, %v4456_v63  ;;  %v5127_v61 = vld [vmem:[%s5519_s5 + $0x20] sm:$0xff]  ;;  %v5126_v63 = vld [vmem:[%s5519_s5 + $0x18] sm:$0xff] }
 0x162   :  { %2811 = vmatpush.bf16.msra.mxu0 %v4171_v42  ;;  %2780 = vmatpush.bf16.msrb.mxu2 %v4471_v6  ;;  %v1788_v42 = vadd.f32 %v1787_v4, %v1774_v16  ;;  %v1790_v29 = vadd.f32 %v1789_v18, %v1776_v24  ;;  %v5118_v4 = vld [vmem:[#allocation4 + $0x3d4] sm:$0xf0]  ;;  %v4583_v16 = vor.u32 %v5110_v15, %v4582_v14  ;;  %v4408_v18 = vld [vmem:[#allocation4 + $0x238] sm:$0xf0]  ;;  %v4550_v24 = vld [vmem:[#allocation4 + $0x348] sm:$0xf] }
 0x163   :  { %2825 = vmatpush.bf16.msra.mxu1 %v4299_v27  ;;  %v4615_v6 = vor.u32 %v5118_v4, %v4614_v3  ;;  %v5125_v3 = vld [vmem:[%s5519_s5 + $0x10] sm:$0xff]  ;;  %v5132_v15 = vld [vmem:[%s5519_s5 + $0x48] sm:$0xff] }
 0x164   :  { %v5137_v4 = vld [vmem:[%s5519_s5 + $0x70] sm:$0xff] }
 0x165   :  { %v5145_v14 = vld [vmem:[%s5519_s5 + $0xb0] sm:$0xff] }
 0x166   :  { %2812 = vmatpush.bf16.msra.mxu0 %v4155_v38  ;;  %2781 = vmatpush.bf16.msrb.mxu2 %v4455_v12  ;;  %v4599_v12 = vor.u32 %v5114_v10, %v4598_v9  ;;  %v5134_v9 = vld [vmem:[%s5519_s5 + $0x58] sm:$0xff] }
 0x167   :  { %2826 = vmatpush.bf16.msra.mxu1 %v4283_v46  ;;  %v5084_v46 = vld [vmem:[#allocation4 + $0x2cc] sm:$0xf]  ;;  %v5146_v10 = vld [vmem:[%s5519_s5 + $0xb8] sm:$0xff] }
 0x168   :  { %v4491_v11 = vor.u32 %v5084_v46, %v4488_v35  ;;  %v5108_v46 = vld [vmem:[#allocation4 + $0x38c] sm:$0xf]  ;;  %v4584_v35 = vld [vmem:[#allocation4 + $0x398] sm:$0xf0] }
 0x169   :  { %2730 = vmatmul.bf16.vlgmr.msra.gmra.mxu2 %v5383_v51 }
 0x16a   :  { %2813 = vmatpush.bf16.msra.mxu0 %v4139_v57  ;;  %v1801_v19 = vpop.f32.mrf.mxu0  ;;  %2782 = vmatpush.bf16.msrb.mxu2 %v4439_v23  ;;  %v4427_v23 = vor.u32 %v5068_v30, %v4424_v13  ;;  %v5133_v13 = vld [vmem:[%s5519_s5 + $0x50] sm:$0xff] }
 0x16b   :  { %2827 = vmatpush.bf16.msra.mxu1 %v4267_v56  ;;  %v1815_v20 = vpop.f32.mrf.mxu1  ;;  %v1802_v41 = vadd.f32 %v1801_v19, %v1788_v42  ;;  %v4566_v19 = vld [vmem:[#allocation4 + $0x368] sm:$0xf]  ;;  %v4392_v42 = vld [vmem:[#allocation4 + $0x218] sm:$0xf0] }
 0x16d   :  { %2814 = vmatmul.bf16.vlgmr.msra.gmra.mxu0 %v5366_v21  ;;  %v5070_v21 = vld [vmem:[#allocation4 + $0x254] sm:$0xf0]  ;;  %v1816_v36 = vadd.f32 %v1815_v20, %v1802_v41  ;;  %v4551_v41 = vor.u32 %v5102_v25, %v4550_v24 }
 0x16e   :  { %2828 = vmatmul.bf16.vlgmr.msra.gmra.mxu1 %v5369_v45  ;;  %v4423_v45 = vor.u32 %v5070_v21, %v4422_v37  ;;  %v5106_v37 = vld [vmem:[#allocation4 + $0x374] sm:$0xf0]  ;;  %v4411_v21 = vor.u32 %v5064_v17, %v4408_v18 }
 0x16f   :  { %v4567_v20 = vor.u32 %v5106_v37, %v4566_v19  ;;  %v5131_v19 = vld [vmem:[%s5519_s5 + $0x40] sm:$0xff] }
 0x170   :  { %2783 = vmatpush.bf16.msrb.mxu2 %v4423_v45  ;;  %v5060_v45 = vld [vmem:[#allocation4 + $0x20c] sm:$0xf]  ;;  %v5143_v37 = vld [vmem:[%s5519_s5 + $0xa0] sm:$0xff] }
 0x171   :  { %v4395_v26 = vor.u32 %v5060_v45, %v4392_v42  ;;  %v5142_v45 = vld [vmem:[%s5519_s5 + $0x98] sm:$0xff] }
 0x172   :  { %v1829_v27 = vpop.f32.mrf.mxu2  ;;  %v1803_v31 = vpop.f32.mrf.mxu0 }
 0x173   :  { %v1843_v2 = vpop.f32.mrf.mxu3  ;;  %v1804_v38 = vadd.f32 %v1803_v31, %v1790_v29  ;;  %v1830_v40 = vadd.f32 %v1829_v27, %v1816_v36  ;;  %v1817_v44 = vpop.f32.mrf.mxu1  ;;  %v4534_v27 = vld [vmem:[#allocation4 + $0x328] sm:$0xf]  ;;  %v5094_v31 = vld [vmem:[#allocation4 + $0x314] sm:$0xf0]  ;;  %v5116_v36 = vld [vmem:[#allocation4 + $0x3cc] sm:$0xf] }
 0x174   :  { %2784 = vmatpush.bf16.msrb.mxu2 %v4407_v28  ;;  %v5098_v28 = vld [vmem:[#allocation4 + $0x334] sm:$0xf0] }
 0x175   :  { %v1818_v47 = vadd.f32 %v1817_v44, %v1804_v38  ;;  %v1844_v49 = vadd.f32 %v1843_v2, %v1830_v40  ;;  %v4535_v29 = vor.u32 %v5098_v28, %v4534_v27  ;;  %v4518_v2 = vld [vmem:[#allocation4 + $0x308] sm:$0xf]  ;;  %v4616_v38 = vld [vmem:[#allocation4 + $0x3d8] sm:$0xf0]  ;;  %v5112_v40 = vld [vmem:[#allocation4 + $0x3ac] sm:$0xf] }
 0x176   :  { %v4519_v22 = vor.u32 %v5094_v31, %v4518_v2  ;;  %v5141_v27 = vld [vmem:[%s5519_s5 + $0x90] sm:$0xff] }
 0x177   :  { %v1851_v56 = vmax.f32 %v1844_v49, 0.0 }
 0x178   :  { %2785 = vmatpush.bf16.msrb.mxu2 %v4391_v39  ;;  %v4619_v39 = vor.u32 %v5116_v36, %v4616_v38 }
 0x17a   :  { %v1831_v48 = vpop.f32.mrf.mxu2 }
 0x17b   :  { %v1832_v50 = vadd.f32 %v1831_v48, %v1818_v47  ;;  %v1845_v52 = vpop.f32.mrf.mxu3  ;;  %2786 = vmatmul.bf16.vlgmr.msrb.gmra.mxu2 %v5383_v51  ;;  %v5104_v47 = vld [vmem:[#allocation4 + $0x36c] sm:$0xf]  ;;  %v4568_v48 = vld [vmem:[#allocation4 + $0x378] sm:$0xf0] }
 0x17c   :  { %2834 = vmatpush.bf16.msra.mxu2 %v4507_v43  ;;  %v4600_v43 = vld [vmem:[#allocation4 + $0x3b8] sm:$0xf0]  ;;  %v4571_v49 = vor.u32 %v5104_v47, %v4568_v48  ;;  %v5153_v47 = vld [vmem:[%s5519_s5 + $0xf0] sm:$0xff] }
 0x17d   :  { %v1846_v57 = vadd.f32 %v1845_v52, %v1832_v50  ;;  %v4603_v44 = vor.u32 %v5112_v40, %v4600_v43  ;;  %v5100_v50 = vld [vmem:[#allocation4 + $0x34c] sm:$0xf]  ;;  %v5139_v40 = vld [vmem:[%s5519_s5 + $0x80] sm:$0xff]  ;;  %v5154_v43 = vld [vmem:[%s5519_s5 + $0xf8] sm:$0xff] }
 0x17f   :  { %v1855_v58 = vmax.f32 %v1846_v57, 0.0  ;;  %v4539_v57 = vor.u32 %v5096_v0, %v4536_v53 }
 0x180   :  { %2835 = vmatpush.bf16.msra.mxu2 %v4491_v11  ;;  %v4552_v11 = vld [vmem:[#allocation4 + $0x358] sm:$0xf0] }
 0x181   :  { %v5393_v1 = vpack.c.bf16 %v1855_v58, %v1851_v56  ;;  %v4555_v52 = vor.u32 %v5100_v50, %v4552_v11  ;;  %v4523_v56 = vor.u32 %v5092_v54, %v4520_v55  ;;  %v5130_v58 = vld [vmem:[%s5519_s5 + $0x38] sm:$0xff]  ;;  %v5152_v11 = vld [vmem:[%s5519_s5 + $0xe8] sm:$0xff]  ;;  %v5151_v55 = vld [vmem:[%s5519_s5 + $0xe0] sm:$0xff] }
 0x182   :  { %3134 = vmatpush.bf16.msrb.mxu0 %v5130_v58 }
 0x183   :  { %2688 = vmatmul.bf16.vlgmr.msrb.gmra.mxu3 %v5393_v1 }
 0x184   :  { %2836 = vmatpush.bf16.msra.mxu2 %v4475_v59  ;;  %2792 = vmatpush.bf16.msrb.mxu3 %v4631_v60  ;;  %v5129_v59 = vld [vmem:[%s5519_s5 + $0x30] sm:$0xff]  ;;  %v5128_v60 = vld [vmem:[%s5519_s5 + $0x28] sm:$0xff] }
 0x186   :  { %3135 = vmatpush.bf16.msrb.mxu0 %v5129_v59 }
 0x188   :  { %2837 = vmatpush.bf16.msra.mxu2 %v4459_v5  ;;  %2793 = vmatpush.bf16.msrb.mxu3 %v4615_v6  ;;  %v5124_v5 = vld [vmem:[%s5519_s5 + $0x8] sm:$0xff] }
 0x189   :  { %v5136_v6 = vld [vmem:[%s5519_s5 + $0x68] sm:$0xff] }
 0x18a   :  { %3136 = vmatpush.bf16.msrb.mxu0 %v5128_v60 }
 0x18c   :  { %2838 = vmatpush.bf16.msra.mxu2 %v4443_v62  ;;  %2794 = vmatpush.bf16.msrb.mxu3 %v4599_v12  ;;  %v2647_v62 = vpop.f32.mrf.mxu0 }
 0x18e   :  { %3137 = vmatpush.bf16.msrb.mxu0 %v5127_v61 }
 0x190   :  { %2839 = vmatpush.bf16.msra.mxu2 %v4427_v23  ;;  %2795 = vmatpush.bf16.msrb.mxu3 %v4583_v16  ;;  %v5144_v23 = vld [vmem:[%s5519_s5 + $0xa8] sm:$0xff]  ;;  %v5457_v16 = vld [vmem:[%s5518_s4] sm:$0xf] }
 0x192   :  { %3138 = vmatpush.bf16.msrb.mxu0 %v5126_v63 }
 0x193   :  { %2744 = vmatmul.bf16.vlgmr.msra.gmra.mxu3 %v5393_v1 }
 0x194   :  { %2840 = vmatpush.bf16.msra.mxu2 %v4411_v21  ;;  %2796 = vmatpush.bf16.msrb.mxu3 %v4567_v20  ;;  %v2649_v17 = vpop.f32.mrf.mxu0  ;;  %v1990_v20 = vperm.slane %v5457_v16, 0 }
 0x196   :  { %3139 = vmatpush.bf16.msrb.mxu0 %v5125_v3  ;;  %v2648_v24 = vadd.f32 %v2647_v62, %v1990_v20 }
 0x198   :  { %2841 = vmatpush.bf16.msra.mxu2 %v4395_v26  ;;  %2797 = vmatpush.bf16.msrb.mxu3 %v4551_v41  ;;  %v2650_v26 = vadd.f32 %v2649_v17, %v1990_v20 }
 0x199   :  { %v2661_v12 = vpop.f32.mrf.mxu1 }
 0x19a   :  { %3140 = vmatpush.bf16.msrb.mxu0 %v5124_v5  ;;  %v2662_v41 = vadd.f32 %v2661_v12, %v2648_v24  ;;  %v5150_v5 = vld [vmem:[%s5519_s5 + $0xd8] sm:$0xff] }
 0x19b   :  { %2842 = vmatmul.bf16.vlgmr.msra.gmra.mxu2 %v5383_v51  ;;  %v4587_v51 = vor.u32 %v5108_v46, %v4584_v35  ;;  %v1991_v46 = vperm.slane %v5457_v16, 1 }
 0x19c   :  { %2798 = vmatpush.bf16.msrb.mxu3 %v4535_v29  ;;  %3162 = vmatpush.bf16.msrb.mxu2 %v5146_v10 }
 0x19e   :  { %3141 = vmatpush.bf16.msrb.mxu0 %v5123_v7 }
 0x1a0   :  { %2799 = vmatpush.bf16.msrb.mxu3 %v4519_v22  ;;  %3163 = vmatpush.bf16.msrb.mxu2 %v5145_v14  ;;  %v5140_v22 = vld [vmem:[%s5519_s5 + $0x88] sm:$0xff] }
 0x1a1   :  { %v2663_v18 = vpop.f32.mrf.mxu1 }
 0x1a2   :  { %v2664_v28 = vadd.f32 %v2663_v18, %v2650_v26 }
 0x1a3   :  { %2800 = vmatmul.bf16.vlgmr.msrb.gmra.mxu3 %v5393_v1 }
 0x1a4   :  { %2848 = vmatpush.bf16.msra.mxu3 %v4635_v34  ;;  %3164 = vmatpush.bf16.msrb.mxu2 %v5144_v23 }
 0x1a8   :  { %2849 = vmatpush.bf16.msra.mxu3 %v4619_v39  ;;  %3165 = vmatpush.bf16.msrb.mxu2 %v5143_v37 }
 0x1aa   :  { %v2703_v25 = vpop.f32.mrf.mxu0 }
 0x1ab   :  { %v2717_v29 = vpop.f32.mrf.mxu1  ;;  %v2704_v50 = vadd.f32 %v2703_v25, %v1991_v46 }
 0x1ac   :  { %2850 = vmatpush.bf16.msra.mxu3 %v4603_v44  ;;  %3166 = vmatpush.bf16.msrb.mxu2 %v5142_v45 }
 0x1ad   :  { %v2718_v0 = vadd.f32 %v2717_v29, %v2704_v50 }
 0x1b0   :  { %2851 = vmatpush.bf16.msra.mxu3 %v4587_v51  ;;  %3167 = vmatpush.bf16.msrb.mxu2 %v5141_v27 }
 0x1b2   :  { %v2705_v44 = vpop.f32.mrf.mxu0 }
 0x1b3   :  { %v2719_v51 = vpop.f32.mrf.mxu1 }
 0x1b4   :  { %2852 = vmatpush.bf16.msra.mxu3 %v4571_v49  ;;  %3168 = vmatpush.bf16.msrb.mxu2 %v5140_v22 }
 0x1b8   :  { %2853 = vmatpush.bf16.msra.mxu3 %v4555_v52  ;;  %3169 = vmatpush.bf16.msrb.mxu2 %v5139_v40  ;;  %v2706_v52 = vadd.f32 %v2705_v44, %v1991_v46 }
 0x1bc   :  { %2854 = vmatpush.bf16.msra.mxu3 %v4539_v57  ;;  %v2720_v57 = vadd.f32 %v2719_v51, %v2706_v52 }
 0x1c0   :  { %2855 = vmatpush.bf16.msra.mxu3 %v4523_v56 }
 0x1c3   :  { %2856 = vmatmul.bf16.vlgmr.msra.gmra.mxu3 %v5393_v1  ;;  %v5138_v1 = vld [vmem:[%s5519_s5 + $0x78] sm:$0xff] }
 0x1c4   :  { %3148 = vmatpush.bf16.msrb.mxu1 %v5138_v1  ;;  %3176 = vmatpush.bf16.msrb.mxu3 %v5154_v43  ;;  %v1992_v1 = vperm.slane %v5457_v16, 2 }
 0x1c8   :  { %3149 = vmatpush.bf16.msrb.mxu1 %v5137_v4  ;;  %3177 = vmatpush.bf16.msrb.mxu3 %v5153_v47 }
 0x1ca   :  { %v2759_v53 = vpop.f32.mrf.mxu0 }
 0x1cb   :  { %v2773_v61 = vpop.f32.mrf.mxu1 }
 0x1cc   :  { %3150 = vmatpush.bf16.msrb.mxu1 %v5136_v6  ;;  %3178 = vmatpush.bf16.msrb.mxu3 %v5152_v11 }
 0x1d0   :  { %3151 = vmatpush.bf16.msrb.mxu1 %v5135_v8  ;;  %3179 = vmatpush.bf16.msrb.mxu3 %v5151_v55  ;;  %v2760_v8 = vadd.f32 %v2759_v53, %v1992_v1 }
 0x1d2   :  { %v2761_v7 = vpop.f32.mrf.mxu0  ;;  %v2774_v12 = vadd.f32 %v2773_v61, %v2760_v8 }
 0x1d3   :  { %v2762_v62 = vadd.f32 %v2761_v7, %v1992_v1 }
 0x1d4   :  { %3152 = vmatpush.bf16.msrb.mxu1 %v5134_v9  ;;  %3180 = vmatpush.bf16.msrb.mxu3 %v5150_v5  ;;  %v5149_v9 = vld [vmem:[%s5519_s5 + $0xd0] sm:$0xff] }
 0x1d8   :  { %3153 = vmatpush.bf16.msrb.mxu1 %v5133_v13  ;;  %3181 = vmatpush.bf16.msrb.mxu3 %v5149_v9  ;;  %v2775_v13 = vpop.f32.mrf.mxu1 }
 0x1dc   :  { %v2675_v30 = vpop.f32.mrf.mxu2  ;;  %3154 = vmatpush.bf16.msrb.mxu1 %v5132_v15  ;;  %v2776_v15 = vadd.f32 %v2775_v13, %v2762_v62 }
 0x1dd   :  { %v2676_v2 = vadd.f32 %v2675_v30, %v2662_v41  ;;  %v5148_v30 = vld [vmem:[%s5519_s5 + $0xc8] sm:$0xff]  ;;  %v1993_v41 = vperm.slane %v5457_v16, 3  ;;  %v5159_v16 = vld [vmem:[%s5520_s6] ss:$0 sm:$0xff] }
 0x1de   :  { %3182 = vmatpush.bf16.msrb.mxu3 %v5148_v30 }
 0x1e0   :  { %3155 = vmatpush.bf16.msrb.mxu1 %v5131_v19  ;;  %v5147_v19 = vld [vmem:[%s5519_s5 + $0xc0] sm:$0xff] }
 0x1e2   :  { %3183 = vmatpush.bf16.msrb.mxu3 %v5147_v19 }
 0x1e4   :  { %v2677_v21 = vpop.f32.mrf.mxu2 }
 0x1e5   :  { %v2678_v32 = vadd.f32 %v2677_v21, %v2664_v28 }
 0x1ea   :  { %v2815_v24 = vpop.f32.mrf.mxu0 }
 0x1eb   :  { %v2829_v25 = vpop.f32.mrf.mxu1  ;;  %v2816_v28 = vadd.f32 %v2815_v24, %v1993_v41 }
 0x1ec   :  { %v2731_v31 = vpop.f32.mrf.mxu2 }
 0x1ed   :  { %v2732_v54 = vadd.f32 %v2731_v31, %v2718_v0  ;;  %v2830_v31 = vadd.f32 %v2829_v25, %v2816_v28 }
 0x1f2   :  { %v2817_v27 = vpop.f32.mrf.mxu0 }
 0x1f4   :  { %v2733_v48 = vpop.f32.mrf.mxu2 }
 0x1f5   :  { %v2734_v56 = vadd.f32 %v2733_v48, %v2720_v57 }
 0x1fe   :  { %v2787_v63 = vpop.f32.mrf.mxu2 }
 0x1ff   :  { %v2788_v23 = vadd.f32 %v2787_v63, %v2774_v12 }
 0x206   :  { %v2689_v42 = vpop.f32.mrf.mxu3  ;;  %v2789_v14 = vpop.f32.mrf.mxu2 }
 0x207   :  { %v2690_v33 = vadd.f32 %v2689_v42, %v2676_v2  ;;  %v2790_v17 = vadd.f32 %v2789_v14, %v2776_v15  ;;  %v2818_v2 = vadd.f32 %v2817_v27, %v1993_v41 }
 0x209   :  { %v2862_v38 = vmax.f32 %v2690_v33, 0.0 }
 0x20e   :  { %v2691_v34 = vpop.f32.mrf.mxu3 }
 0x20f   :  { %v2692_v36 = vadd.f32 %v2691_v34, %v2678_v32  ;;  %v2831_v32 = vpop.f32.mrf.mxu1 }
 0x210   :  { %v2832_v22 = vadd.f32 %v2831_v32, %v2818_v2 }
 0x211   :  { %v2866_v39 = vmax.f32 %v2692_v36, 0.0 }
 0x213   :  { %v2870_v35 = vpack.c.bf16 %v2866_v39, %v2862_v38 }
 0x215   :  { %3142 = vmatmul.bf16.vlgmr.msrb.gmra.mxu0 %v2870_v35 }
 0x216   :  { %v2745_v49 = vpop.f32.mrf.mxu3 }
 0x217   :  { %v2746_v58 = vadd.f32 %v2745_v49, %v2732_v54 }
 0x219   :  { %v2863_v3 = vmax.f32 %v2746_v58, 0.0 }
 0x21e   :  { %v2747_v59 = vpop.f32.mrf.mxu3  ;;  %v2843_v26 = vpop.f32.mrf.mxu2 }
 0x21f   :  { %v2748_v60 = vadd.f32 %v2747_v59, %v2734_v56  ;;  %v2844_v34 = vadd.f32 %v2843_v26, %v2830_v31 }
 0x221   :  { %v2867_v4 = vmax.f32 %v2748_v60, 0.0 }
 0x223   :  { %v2871_v6 = vpack.c.bf16 %v2867_v4, %v2863_v3 }
 0x225   :  { %3156 = vmatmul.bf16.vlgmr.msrb.gmra.mxu1 %v2871_v6 }
 0x226   :  { %v2801_v10 = vpop.f32.mrf.mxu3  ;;  %v2845_v33 = vpop.f32.mrf.mxu2 }
 0x227   :  { %v2802_v18 = vadd.f32 %v2801_v10, %v2788_v23  ;;  %v2846_v36 = vadd.f32 %v2845_v33, %v2832_v22 }
 0x229   :  { %v2864_v20 = vmax.f32 %v2802_v18, 0.0 }
 0x22e   :  { %v2803_v37 = vpop.f32.mrf.mxu3 }
 0x22f   :  { %v2804_v21 = vadd.f32 %v2803_v37, %v2790_v17 }
 0x231   :  { %v2868_v45 = vmax.f32 %v2804_v21, 0.0 }
 0x233   :  { %v2872_v42 = vpack.c.bf16 %v2868_v45, %v2864_v20 }
 0x235   :  { %3170 = vmatmul.bf16.vlgmr.msrb.gmra.mxu2 %v2872_v42 }
 0x246   :  { %v2857_v29 = vpop.f32.mrf.mxu3 }
 0x247   :  { %v2858_v38 = vadd.f32 %v2857_v29, %v2844_v34 }
 0x249   :  { %v2865_v43 = vmax.f32 %v2858_v38, 0.0 }
 0x24e   :  { %v2859_v39 = vpop.f32.mrf.mxu3 }
 0x24f   :  { %v2860_v40 = vadd.f32 %v2859_v39, %v2846_v36 }
 0x251   :  { %v2869_v44 = vmax.f32 %v2860_v40, 0.0 }
 0x253   :  { %v2873_v46 = vpack.c.bf16 %v2869_v44, %v2865_v43 }
 0x255   :  { %3184 = vmatmul.bf16.vlgmr.msrb.gmra.mxu3 %v2873_v46 }
 0x292   :  { %v3143_v35 = vpop.f32.mrf.mxu0 }
 0x293   :  { %v3144_v48 = vadd.f32 %v5159_v16, %v3143_v35 }
 0x29a   :  { %v3145_v11 = vpop.f32.mrf.mxu0 }
 0x29b   :  { %v3146_v57 = vadd.f32 %v5159_v16, %v3145_v11 }
 0x2a2   :  { %v3157_v51 = vpop.f32.mrf.mxu1 }
 0x2a3   :  { %v3158_v49 = vadd.f32 %v3157_v51, %v3144_v48 }
 0x2aa   :  { %v3159_v53 = vpop.f32.mrf.mxu1 }
 0x2ab   :  { %v3160_v56 = vadd.f32 %v3159_v53, %v3146_v57 }
 0x2b8   :  { %v3171_v47 = vpop.f32.mrf.mxu2 }
 0x2b9   :  { %v3172_v50 = vadd.f32 %v3171_v47, %v3158_v49 }
 0x2c0   :  { %v3173_v55 = vpop.f32.mrf.mxu2 }
 0x2c1   :  { %v3174_v58 = vadd.f32 %v3173_v55, %v3160_v56 }
 0x2d8   :  { %v3185_v52 = vpop.f32.mrf.mxu3 }
 0x2d9   :  { %v3186_v0 = vadd.f32 %v3185_v52, %v3172_v50 }
 0x2db   :  { %v3190_v54 = vmax.f32 %v3186_v0, 0.0 }
 0x2dd   :  { %3192 = vst [vmem:[%s5521_s7] sm:$0xff] %v3190_v54 }
 0x2e0   :  { %v3187_v59 = vpop.f32.mrf.mxu3 }
 0x2e1   :  { %v3188_v60 = vadd.f32 %v3187_v59, %v3174_v58 }
 0x2e3   :  { %v3191_v61 = vmax.f32 %v3188_v60, 0.0 }
 0x2e5   :  { %3193 = vst [vmem:[%s5521_s7 + $0x8] sm:$0xff] %v3191_v61 }
 0x2e6   :  { %3198 = vsyncpa [#allocation3], 1 }
 0x2e7   :  { %3199 = vsyncpa [#allocation5], 1 }

</bundles_post_ra>
